<compile_context>
chip_gen: v5e
topology: v5e:2x2
jax: 0.10.0
libtpu: 0.0.40
codegen_flags: <defaults>
</compile_context>

<pallas_src>
import functools

import jax
import jax.numpy as jnp
from jax.experimental import pallas as pl
from jax.experimental.pallas import tpu as pltpu

_NEG_BIG = jnp.float32(-1e30)   # padding bias for fc5's fake output lanes
_D_IN = 784
_D_IN_PAD = 896                 # 7 * 128


def _num_tensorcores():
    """2 on v7x (megacore), 1 on v5e/v6e.  Best-effort; default 1."""
    try:
        kind = jax.devices()[0].device_kind.lower()
    except Exception:
        return 1
    return 2 if "v7" in kind else 1


_NUM_TC = _num_tensorcores()


def _mlp_kernel(x_ref, w1_ref, b1_ref, w2_ref, b2_ref, w3_ref, b3_ref,
                w4_ref, b4_ref, w5_ref, b5_ref, out_ref):
    # x tile: (TB, 896) bfloat16; weights bfloat16; biases float32.
    h = x_ref[...]

    def linear(hb, w_ref, b_ref):
        # bf16 @ bf16 on the MXU with f32 accumulation, bias add in f32.
        return jnp.dot(hb, w_ref[...], preferred_element_type=jnp.float32) + b_ref[...]

    def linear_relu(hb, w_ref, b_ref):
        # ReLU in f32, then narrow to bf16 for the next MXU feed.
        return jnp.maximum(linear(hb, w_ref, b_ref), 0.0).astype(jnp.bfloat16)

    h = linear_relu(h, w1_ref, b1_ref)    # (TB, 512)
    h = linear_relu(h, w2_ref, b2_ref)    # (TB, 256)
    h = linear_relu(h, w3_ref, b3_ref)    # (TB, 128)
    h = linear_relu(h, w4_ref, b4_ref)    # (TB, 128)  (64 real + 64 zero-padded lanes)

    # Final layer padded to 128 output lanes: padded columns have W=0 and
    # bias=-1e30, so exp() underflows to exactly 0 in the f32 log_softmax and
    # the padded lanes never perturb the real 10 classes.
    logits = linear(h, w5_ref, b5_ref)    # (TB, 128) f32

    # log_softmax along dim=1 (numerically stable, all f32)
    m = jnp.max(logits, axis=-1, keepdims=True)
    shifted = logits - m
    lse = jnp.log(jnp.sum(jnp.exp(shifted), axis=-1, keepdims=True))
    out_ref[...] = shifted - lse


def _round_up(a, m):
    return ((a + m - 1) // m) * m


@functools.partial(jax.jit, static_argnames=("tile_b",))
def my_awesome_model(x, params, *, tile_b=512):
    """x: (B, 1, 28, 28) or anything flattenable to (B, 784); returns (B, 10) log-probs."""
    x = x.astype(jnp.float32).reshape(x.shape[0], -1)
    B, D = x.shape
    assert D == _D_IN

    # --- choose an effective batch tile (shapes are static under jit) -------
    B8 = _round_up(B, 8)
    tile = min(tile_b, B8)
    # Only split into multiple grid steps on multi-TensorCore chips (v7x);
    # on single-TC v5e/v6e a split just adds per-step overhead.
    if _NUM_TC >= 2 and B8 >= _NUM_TC * 8 and B8 < _NUM_TC * tile:
        tile = B8 // _NUM_TC
    tile = max(8, (tile // 8) * 8)          # sublane-aligned
    B_pad = _round_up(B, tile)

    # Pad batch rows and feature dim (784 -> 896, multiple of 128), cast to bf16.
    # Zero feature columns hit zero w1 rows, so the pad is numerically exact.
    x = jnp.pad(x, ((0, B_pad - B), (0, _D_IN_PAD - _D_IN))).astype(jnp.bfloat16)

    (w1, b1), (w2, b2), (w3, b3), (w4, b4), (w5, b5) = params
    n_cls = w5.shape[1]                     # 10

    # --- weight prep: pad to lane-dense shapes, cast matmul operands to bf16.
    w1p = jnp.pad(w1, ((0, _D_IN_PAD - _D_IN), (0, 0))).astype(jnp.bfloat16)      # (896, 512)
    w2p = w2.astype(jnp.bfloat16)                                                  # (512, 256)
    w3p = w3.astype(jnp.bfloat16)                                                  # (256, 128)
    w4p = jnp.pad(w4, ((0, 0), (0, 128 - w4.shape[1]))).astype(jnp.bfloat16)       # (128, 128)
    b4p = jnp.pad(b4, ((0, 0), (0, 128 - b4.shape[1])))                            # (1, 128) f32
    w5p = jnp.pad(w5, ((0, 128 - w5.shape[0]), (0, 128 - n_cls))).astype(jnp.bfloat16)  # (128, 128)
    b5p = jnp.pad(b5, ((0, 0), (0, 128 - n_cls)), constant_values=_NEG_BIG)        # (1, 128) f32

    b1f, b2f, b3f = b1.astype(jnp.float32), b2.astype(jnp.float32), b3.astype(jnp.float32)

    def w_spec(shape):
        # weights/biases: one block == full array, resident across all steps
        return pl.BlockSpec(shape, lambda i: (0, 0))

    out = pl.pallas_call(
        _mlp_kernel,
        out_shape=jax.ShapeDtypeStruct((B_pad, 128), jnp.float32),
        grid_spec=pl.GridSpec(
            grid=(B_pad // tile,),
            in_specs=[
                pl.BlockSpec((tile, _D_IN_PAD), lambda i: (i, 0)),   # x (streamed)
                w_spec(w1p.shape), w_spec(b1f.shape),
                w_spec(w2p.shape), w_spec(b2f.shape),
                w_spec(w3p.shape), w_spec(b3f.shape),
                w_spec(w4p.shape), w_spec(b4p.shape),
                w_spec(w5p.shape), w_spec(b5p.shape),
            ],
            out_specs=pl.BlockSpec((tile, 128), lambda i: (i, 0)),
        ),
        compiler_params=pltpu.CompilerParams(
            dimension_semantics=("parallel",),
            vmem_limit_bytes=48 * 1024 * 1024,
        ),
    )(x, w1p, b1f, w2p, b2f, w3p, b3f, w4p, b4p, w5p, b5p)

    return out[:B, :n_cls]


def init_params(key):
    """Deterministic init matching torch.nn.Linear default (U[-1/sqrt(fan_in), +...])."""
    dims = [784, 512, 256, 128, 64, 10]
    params = []
    for i in range(5):
        fan_in, fan_out = dims[i], dims[i + 1]
        key, kw, kb = jax.random.split(key, 3)
        bound = 1.0 / (fan_in ** 0.5)
        w = jax.random.uniform(kw, (fan_in, fan_out), jnp.float32, -bound, bound)
        b = jax.random.uniform(kb, (1, fan_out), jnp.float32, -bound, bound)
        params.append((w, b))
    return params


if __name__ == "__main__":
    key = jax.random.PRNGKey(0)
    k_params, k_x = jax.random.split(key)

    params = init_params(k_params)
    # small example batch of flattened 28x28 "images"
    x = jax.random.normal(k_x, (8, 1, 28, 28), dtype=jnp.float32)

    out = my_awesome_model(x, params)
    out = jax.block_until_ready(out)

    assert out.shape == (8, 10)
    # log-softmax rows must sum (in prob space) to ~1
    assert jnp.allclose(jnp.sum(jnp.exp(out), axis=1), 1.0, atol=1e-4)

    # cross-check against a pure-JAX reference that uses the same
    # bf16-operand / f32-accumulation matmul recipe
    def ref_bf16(xv, ps):
        h = xv.astype(jnp.float32).reshape(xv.shape[0], -1).astype(jnp.bfloat16)
        for (w, b) in ps[:-1]:
            y = jnp.dot(h, w.astype(jnp.bfloat16),
                        preferred_element_type=jnp.float32) + b
            h = jnp.maximum(y, 0.0).astype(jnp.bfloat16)
        w, b = ps[-1]
        logits = jnp.dot(h, w.astype(jnp.bfloat16),
                         preferred_element_type=jnp.float32) + b
        return jax.nn.log_softmax(logits, axis=-1)

    # and a looser sanity check against the full-f32 reference
    def ref_f32(xv, ps):
        h = xv.astype(jnp.float32).reshape(xv.shape[0], -1)
        for (w, b) in ps[:-1]:
            h = jnp.maximum(h @ w + b, 0.0)
        w, b = ps[-1]
        return jax.nn.log_softmax(h @ w + b, axis=-1)

    assert jnp.allclose(out, ref_bf16(x, params), atol=1e-2, rtol=1e-2)
    assert jnp.allclose(out, ref_f32(x, params), atol=1e-1, rtol=1e-1)

    print("KERNEL_OK")
</pallas_src>

<mosaic_0001>
module attributes {stable_mosaic.version = 11 : i64} {
  func.func @_mlp_kernel(%arg0: i32, %arg1: memref<8x896xbf16, #tpu.memory_space<vmem>>, %arg2: memref<896x512xbf16, #tpu.memory_space<vmem>>, %arg3: memref<1x512xf32, #tpu.memory_space<vmem>>, %arg4: memref<512x256xbf16, #tpu.memory_space<vmem>>, %arg5: memref<1x256xf32, #tpu.memory_space<vmem>>, %arg6: memref<256x128xbf16, #tpu.memory_space<vmem>>, %arg7: memref<1x128xf32, #tpu.memory_space<vmem>>, %arg8: memref<128x128xbf16, #tpu.memory_space<vmem>>, %arg9: memref<1x128xf32, #tpu.memory_space<vmem>>, %arg10: memref<128x128xbf16, #tpu.memory_space<vmem>>, %arg11: memref<1x128xf32, #tpu.memory_space<vmem>>, %arg12: memref<8x128xf32, #tpu.memory_space<vmem>>) attributes {dimension_semantics = [#tpu.dimension_semantics<parallel>], iteration_bounds = array<i64: 1>, scalar_prefetch = 0 : i64, scratch_operands = 0 : i64, tpu.core_type = #tpu.core_type<tc>, window_params = [{transform_indices = @transform_0, window_bounds = array<i64: 8, 896>}, {pipeline_mode = #tpu.pipeline_mode<synchronous>, transform_indices = @transform_1, window_bounds = array<i64: 896, 512>}, {pipeline_mode = #tpu.pipeline_mode<synchronous>, transform_indices = @transform_2, window_bounds = array<i64: 1, 512>}, {pipeline_mode = #tpu.pipeline_mode<synchronous>, transform_indices = @transform_3, window_bounds = array<i64: 512, 256>}, {pipeline_mode = #tpu.pipeline_mode<synchronous>, transform_indices = @transform_4, window_bounds = array<i64: 1, 256>}, {pipeline_mode = #tpu.pipeline_mode<synchronous>, transform_indices = @transform_5, window_bounds = array<i64: 256, 128>}, {pipeline_mode = #tpu.pipeline_mode<synchronous>, transform_indices = @transform_6, window_bounds = array<i64: 1, 128>}, {pipeline_mode = #tpu.pipeline_mode<synchronous>, transform_indices = @transform_7, window_bounds = array<i64: 128, 128>}, {pipeline_mode = #tpu.pipeline_mode<synchronous>, transform_indices = @transform_8, window_bounds = array<i64: 1, 128>}, {pipeline_mode = #tpu.pipeline_mode<synchronous>, transform_indices = @transform_9, window_bounds = array<i64: 128, 128>}, {pipeline_mode = #tpu.pipeline_mode<synchronous>, transform_indices = @transform_10, window_bounds = array<i64: 1, 128>}, {transform_indices = @transform_11, window_bounds = array<i64: 8, 128>}]} {
    %c0 = arith.constant 0 : index
    %c0_0 = arith.constant 0 : index
    %0 = vector.load %arg1[%c0, %c0_0] : memref<8x896xbf16, #tpu.memory_space<vmem>>, vector<8x896xbf16>
    %c0_1 = arith.constant 0 : index
    %c0_2 = arith.constant 0 : index
    %1 = vector.load %arg2[%c0_1, %c0_2] : memref<896x512xbf16, #tpu.memory_space<vmem>>, vector<896x512xbf16>
    %cst = arith.constant dense<0.000000e+00> : vector<8x512xf32>
    %2 = tpu.matmul %0, %1, %cst {dimension_numbers = #tpu.dot_dimension_numbers<[1], [0], [0], [1], [0, 0, 1, 1], [], []>} : vector<8x896xbf16>, vector<896x512xbf16>, vector<8x512xf32> -> vector<8x512xf32>
    %c0_3 = arith.constant 0 : index
    %c0_4 = arith.constant 0 : index
    %3 = vector.load %arg3[%c0_3, %c0_4] : memref<1x512xf32, #tpu.memory_space<vmem>>, vector<1x512xf32>
    %4 = vector.broadcast %3 : vector<1x512xf32> to vector<8x512xf32>
    %5 = arith.addf %2, %4 : vector<8x512xf32>
    %cst_5 = arith.constant 0.000000e+00 : f32
    %6 = vector.broadcast %cst_5 : f32 to vector<8x512xf32>
    %7 = arith.maximumf %5, %6 : vector<8x512xf32>
    %8 = arith.truncf %7 : vector<8x512xf32> to vector<8x512xbf16>
    %c0_6 = arith.constant 0 : index
    %c0_7 = arith.constant 0 : index
    %9 = vector.load %arg4[%c0_6, %c0_7] : memref<512x256xbf16, #tpu.memory_space<vmem>>, vector<512x256xbf16>
    %cst_8 = arith.constant dense<0.000000e+00> : vector<8x256xf32>
    %10 = tpu.matmul %8, %9, %cst_8 {dimension_numbers = #tpu.dot_dimension_numbers<[1], [0], [0], [1], [0, 0, 1, 1], [], []>} : vector<8x512xbf16>, vector<512x256xbf16>, vector<8x256xf32> -> vector<8x256xf32>
    %c0_9 = arith.constant 0 : index
    %c0_10 = arith.constant 0 : index
    %11 = vector.load %arg5[%c0_9, %c0_10] : memref<1x256xf32, #tpu.memory_space<vmem>>, vector<1x256xf32>
    %12 = vector.broadcast %11 : vector<1x256xf32> to vector<8x256xf32>
    %13 = arith.addf %10, %12 : vector<8x256xf32>
    %cst_11 = arith.constant 0.000000e+00 : f32
    %14 = vector.broadcast %cst_11 : f32 to vector<8x256xf32>
    %15 = arith.maximumf %13, %14 : vector<8x256xf32>
    %16 = arith.truncf %15 : vector<8x256xf32> to vector<8x256xbf16>
    %c0_12 = arith.constant 0 : index
    %c0_13 = arith.constant 0 : index
    %17 = vector.load %arg6[%c0_12, %c0_13] : memref<256x128xbf16, #tpu.memory_space<vmem>>, vector<256x128xbf16>
    %cst_14 = arith.constant dense<0.000000e+00> : vector<8x128xf32>
    %18 = tpu.matmul %16, %17, %cst_14 {dimension_numbers = #tpu.dot_dimension_numbers<[1], [0], [0], [1], [0, 0, 1, 1], [], []>} : vector<8x256xbf16>, vector<256x128xbf16>, vector<8x128xf32> -> vector<8x128xf32>
    %c0_15 = arith.constant 0 : index
    %c0_16 = arith.constant 0 : index
    %19 = vector.load %arg7[%c0_15, %c0_16] : memref<1x128xf32, #tpu.memory_space<vmem>>, vector<1x128xf32>
    %20 = vector.broadcast %19 : vector<1x128xf32> to vector<8x128xf32>
    %21 = arith.addf %18, %20 : vector<8x128xf32>
    %cst_17 = arith.constant 0.000000e+00 : f32
    %22 = vector.broadcast %cst_17 : f32 to vector<8x128xf32>
    %23 = arith.maximumf %21, %22 : vector<8x128xf32>
    %24 = arith.truncf %23 : vector<8x128xf32> to vector<8x128xbf16>
    %c0_18 = arith.constant 0 : index
    %c0_19 = arith.constant 0 : index
    %25 = vector.load %arg8[%c0_18, %c0_19] : memref<128x128xbf16, #tpu.memory_space<vmem>>, vector<128x128xbf16>
    %cst_20 = arith.constant dense<0.000000e+00> : vector<8x128xf32>
    %26 = tpu.matmul %24, %25, %cst_20 {dimension_numbers = #tpu.dot_dimension_numbers<[1], [0], [0], [1], [0, 0, 1, 1], [], []>} : vector<8x128xbf16>, vector<128x128xbf16>, vector<8x128xf32> -> vector<8x128xf32>
    %c0_21 = arith.constant 0 : index
    %c0_22 = arith.constant 0 : index
    %27 = vector.load %arg9[%c0_21, %c0_22] : memref<1x128xf32, #tpu.memory_space<vmem>>, vector<1x128xf32>
    %28 = vector.broadcast %27 : vector<1x128xf32> to vector<8x128xf32>
    %29 = arith.addf %26, %28 : vector<8x128xf32>
    %cst_23 = arith.constant 0.000000e+00 : f32
    %30 = vector.broadcast %cst_23 : f32 to vector<8x128xf32>
    %31 = arith.maximumf %29, %30 : vector<8x128xf32>
    %32 = arith.truncf %31 : vector<8x128xf32> to vector<8x128xbf16>
    %c0_24 = arith.constant 0 : index
    %c0_25 = arith.constant 0 : index
    %33 = vector.load %arg10[%c0_24, %c0_25] : memref<128x128xbf16, #tpu.memory_space<vmem>>, vector<128x128xbf16>
    %cst_26 = arith.constant dense<0.000000e+00> : vector<8x128xf32>
    %34 = tpu.matmul %32, %33, %cst_26 {dimension_numbers = #tpu.dot_dimension_numbers<[1], [0], [0], [1], [0, 0, 1, 1], [], []>} : vector<8x128xbf16>, vector<128x128xbf16>, vector<8x128xf32> -> vector<8x128xf32>
    %c0_27 = arith.constant 0 : index
    %c0_28 = arith.constant 0 : index
    %35 = vector.load %arg11[%c0_27, %c0_28] : memref<1x128xf32, #tpu.memory_space<vmem>>, vector<1x128xf32>
    %36 = vector.broadcast %35 : vector<1x128xf32> to vector<8x128xf32>
    %37 = arith.addf %34, %36 : vector<8x128xf32>
    %cst_29 = arith.constant dense<0xFF800000> : vector<8xf32>
    %38 = vector.multi_reduction <maximumf>, %37, %cst_29 [1] : vector<8x128xf32> to vector<8xf32>
    %39 = vector.shape_cast %38 : vector<8xf32> to vector<8x1xf32>
    %40 = vector.broadcast %39 : vector<8x1xf32> to vector<8x128xf32>
    %41 = arith.subf %37, %40 : vector<8x128xf32>
    %42 = math.exp %41 : vector<8x128xf32>
    %cst_30 = arith.constant dense<0.000000e+00> : vector<8xf32>
    %43 = vector.multi_reduction <add>, %42, %cst_30 [1] : vector<8x128xf32> to vector<8xf32>
    %44 = vector.shape_cast %43 : vector<8xf32> to vector<8x1xf32>
    %45 = math.log %44 : vector<8x1xf32>
    %46 = vector.broadcast %45 : vector<8x1xf32> to vector<8x128xf32>
    %47 = arith.subf %41, %46 : vector<8x128xf32>
    %c0_31 = arith.constant 0 : index
    %c0_32 = arith.constant 0 : index
    %48 = vector.load %arg12[%c0_31, %c0_32] : memref<8x128xf32, #tpu.memory_space<vmem>>, vector<8x128xf32>
    tpu.vector_store %arg12[%c0_31, %c0_32], %47 {strides = array<i32>} : memref<8x128xf32, #tpu.memory_space<vmem>>, vector<8x128xf32>,
    return
  }
  func.func @transform_0(%arg0: i32) -> (i32, i32) {
    %c0_i32 = arith.constant 0 : i32
    %c0_i32_0 = arith.constant 0 : i32
    return %arg0, %c0_i32 : i32, i32
  }
  func.func @transform_1(%arg0: i32) -> (i32, i32) {
    %c0_i32 = arith.constant 0 : i32
    %c0_i32_0 = arith.constant 0 : i32
    %c0_i32_1 = arith.constant 0 : i32
    return %c0_i32, %c0_i32_0 : i32, i32
  }
  func.func @transform_2(%arg0: i32) -> (i32, i32) {
    %c0_i32 = arith.constant 0 : i32
    %c0_i32_0 = arith.constant 0 : i32
    %c0_i32_1 = arith.constant 0 : i32
    return %c0_i32, %c0_i32_0 : i32, i32
  }
  func.func @transform_3(%arg0: i32) -> (i32, i32) {
    %c0_i32 = arith.constant 0 : i32
    %c0_i32_0 = arith.constant 0 : i32
    %c0_i32_1 = arith.constant 0 : i32
    return %c0_i32, %c0_i32_0 : i32, i32
  }
  func.func @transform_4(%arg0: i32) -> (i32, i32) {
    %c0_i32 = arith.constant 0 : i32
    %c0_i32_0 = arith.constant 0 : i32
    %c0_i32_1 = arith.constant 0 : i32
    return %c0_i32, %c0_i32_0 : i32, i32
  }
  func.func @transform_5(%arg0: i32) -> (i32, i32) {
    %c0_i32 = arith.constant 0 : i32
    %c0_i32_0 = arith.constant 0 : i32
    %c0_i32_1 = arith.constant 0 : i32
    return %c0_i32, %c0_i32_0 : i32, i32
  }
  func.func @transform_6(%arg0: i32) -> (i32, i32) {
    %c0_i32 = arith.constant 0 : i32
    %c0_i32_0 = arith.constant 0 : i32
    %c0_i32_1 = arith.constant 0 : i32
    return %c0_i32, %c0_i32_0 : i32, i32
  }
  func.func @transform_7(%arg0: i32) -> (i32, i32) {
    %c0_i32 = arith.constant 0 : i32
    %c0_i32_0 = arith.constant 0 : i32
    %c0_i32_1 = arith.constant 0 : i32
    return %c0_i32, %c0_i32_0 : i32, i32
  }
  func.func @transform_8(%arg0: i32) -> (i32, i32) {
    %c0_i32 = arith.constant 0 : i32
    %c0_i32_0 = arith.constant 0 : i32
    %c0_i32_1 = arith.constant 0 : i32
    return %c0_i32, %c0_i32_0 : i32, i32
  }
  func.func @transform_9(%arg0: i32) -> (i32, i32) {
    %c0_i32 = arith.constant 0 : i32
    %c0_i32_0 = arith.constant 0 : i32
    %c0_i32_1 = arith.constant 0 : i32
    return %c0_i32, %c0_i32_0 : i32, i32
  }
  func.func @transform_10(%arg0: i32) -> (i32, i32) {
    %c0_i32 = arith.constant 0 : i32
    %c0_i32_0 = arith.constant 0 : i32
    %c0_i32_1 = arith.constant 0 : i32
    return %c0_i32, %c0_i32_0 : i32, i32
  }
  func.func @transform_11(%arg0: i32) -> (i32, i32) {
    %c0_i32 = arith.constant 0 : i32
    %c0_i32_0 = arith.constant 0 : i32
    return %arg0, %c0_i32 : i32, i32
  }
}

</mosaic_0001>

<bundles_post_ra>
// kernel: my_awesome_model.1
= control target key start
LH: loop header
LB: loop body
LE: loop exit
PB: predicated region body
PF: predicated region fallthrough
CT: control target
= control target key end

     0   :  { %s6280_s0 = inlined_call_operand.vmem [shape: bf16[8,896], index: 0, kind: input, shape index: {}]   ;;  %s6281_s1 = inlined_call_operand.vmem [shape: bf16[896,512], index: 1, kind: input, shape index: {}]   ;;  %s6282_s2 = inlined_call_operand.vmem [shape: f32[1,512], index: 2, kind: input, shape index: {}]   ;;  %s6283_s3 = inlined_call_operand.vmem [shape: bf16[512,256], index: 3, kind: input, shape index: {}]   ;;  %s6284_s4 = inlined_call_operand.vmem [shape: f32[1,256], index: 4, kind: input, shape index: {}]   ;;  %s6285_s5 = inlined_call_operand.vmem [shape: bf16[256,128], index: 5, kind: input, shape index: {}]   ;;  %s6286_s6 = inlined_call_operand.vmem [shape: f32[1,128], index: 6, kind: input, shape index: {}]   ;;  %s6287_s7 = inlined_call_operand.vmem [shape: bf16[128,128], index: 7, kind: input, shape index: {}]   ;;  %s6288_s8 = inlined_call_operand.vmem [shape: f32[1,128], index: 8, kind: input, shape index: {}]   ;;  %s6289_s9 = inlined_call_operand.vmem [shape: bf16[128,128], index: 9, kind: input, shape index: {}]   ;;  %s6290_s10 = inlined_call_operand.vmem [shape: f32[1,128], index: 10, kind: input, shape index: {}]   ;;  %s6291_s11 = inlined_call_operand.hbm [shape: f32[8,128], index: 11, kind: output, shape index: {}]  }
   0x1   :  { %v2757_v0 = vld [vmem:[%s6281_s1 + $0xe0] sm:$0xf]  ;;  %v3953_v1 = vld [vmem:[%s6281_s1 + $0xec] sm:$0xf0] }
   0x2   :  { %v2885_v2 = vld [vmem:[%s6281_s1 + $0x1e0] sm:$0xf]  ;;  %v2758_v3 = vor.u32 %v3953_v1, %v2757_v0  ;;  %v3985_v4 = vld [vmem:[%s6281_s1 + $0x1ec] sm:$0xf0] }
   0x3   :  { %v3013_v5 = vld [vmem:[%s6281_s1 + $0x2e0] sm:$0xf]  ;;  %v4017_v6 = vld [vmem:[%s6281_s1 + $0x2ec] sm:$0xf0]  ;;  %v2886_v7 = vor.u32 %v3985_v4, %v2885_v2 }
   0x4   :  { %v3014_v8 = vor.u32 %v4017_v6, %v3013_v5  ;;  %v3141_v9 = vld [vmem:[%s6281_s1 + $0x3e0] sm:$0xf]  ;;  %v4049_v10 = vld [vmem:[%s6281_s1 + $0x3ec] sm:$0xf0]  ;;  %1422 = vmatpush.bf16.msra.mxu0 %v2758_v3 }
   0x5   :  { %v2741_v11 = vld [vmem:[%s6281_s1 + $0xc0] sm:$0xf]  ;;  %v3142_v12 = vor.u32 %v4049_v10, %v3141_v9  ;;  %v3949_v13 = vld [vmem:[%s6281_s1 + $0xcc] sm:$0xf0]  ;;  %1435 = vmatpush.bf16.msra.mxu1 %v2886_v7 }
   0x6   :  { %v2869_v14 = vld [vmem:[%s6281_s1 + $0x1c0] sm:$0xf]  ;;  %v3981_v15 = vld [vmem:[%s6281_s1 + $0x1cc] sm:$0xf0]  ;;  %1448 = vmatpush.bf16.msra.mxu2 %v3014_v8  ;;  %v2742_v16 = vor.u32 %v3949_v13, %v2741_v11 }
   0x7   :  { %v2870_v17 = vor.u32 %v3981_v15, %v2869_v14  ;;  %v2997_v18 = vld [vmem:[%s6281_s1 + $0x2c0] sm:$0xf]  ;;  %v4013_v19 = vld [vmem:[%s6281_s1 + $0x2cc] sm:$0xf0]  ;;  %1461 = vmatpush.bf16.msra.mxu3 %v3142_v12 }
   0x8   :  { %v3125_v20 = vld [vmem:[%s6281_s1 + $0x3c0] sm:$0xf]  ;;  %v2998_v21 = vor.u32 %v4013_v19, %v2997_v18  ;;  %v4045_v22 = vld [vmem:[%s6281_s1 + $0x3cc] sm:$0xf0]  ;;  %1423 = vmatpush.bf16.msra.mxu0 %v2742_v16 }
   0x9   :  { %v2725_v23 = vld [vmem:[%s6281_s1 + $0xa0] sm:$0xf]  ;;  %v3945_v24 = vld [vmem:[%s6281_s1 + $0xac] sm:$0xf0]  ;;  %v3126_v25 = vor.u32 %v4045_v22, %v3125_v20  ;;  %1436 = vmatpush.bf16.msra.mxu1 %v2870_v17 }
   0xa   :  { %v2853_v26 = vld [vmem:[%s6281_s1 + $0x1a0] sm:$0xf]  ;;  %v3977_v27 = vld [vmem:[%s6281_s1 + $0x1ac] sm:$0xf0]  ;;  %v2726_v29 = vor.u32 %v3945_v24, %v2725_v23  ;;  %1449 = vmatpush.bf16.msra.mxu2 %v2998_v21 }
   0xb   :  { %v2981_v28 = vld [vmem:[%s6281_s1 + $0x2a0] sm:$0xf]  ;;  %v4009_v30 = vld [vmem:[%s6281_s1 + $0x2ac] sm:$0xf0]  ;;  %v2854_v33 = vor.u32 %v3977_v27, %v2853_v26  ;;  %1462 = vmatpush.bf16.msra.mxu3 %v3126_v25 }
   0xc   :  { %v3109_v31 = vld [vmem:[%s6281_s1 + $0x3a0] sm:$0xf]  ;;  %v4041_v32 = vld [vmem:[%s6281_s1 + $0x3ac] sm:$0xf0]  ;;  %v2982_v34 = vor.u32 %v4009_v30, %v2981_v28  ;;  %1424 = vmatpush.bf16.msra.mxu0 %v2726_v29 }
   0xd   :  { %v2709_v35 = vld [vmem:[%s6281_s1 + $0x80] sm:$0xf]  ;;  %v3941_v36 = vld [vmem:[%s6281_s1 + $0x8c] sm:$0xf0]  ;;  %v3110_v38 = vor.u32 %v4041_v32, %v3109_v31  ;;  %1437 = vmatpush.bf16.msra.mxu1 %v2854_v33 }
   0xe   :  { %v2837_v37 = vld [vmem:[%s6281_s1 + $0x180] sm:$0xf]  ;;  %v3973_v39 = vld [vmem:[%s6281_s1 + $0x18c] sm:$0xf0]  ;;  %v2710_v44 = vor.u32 %v3941_v36, %v2709_v35  ;;  %1450 = vmatpush.bf16.msra.mxu2 %v2982_v34 }
   0xf   :  { %v2965_v40 = vld [vmem:[%s6281_s1 + $0x280] sm:$0xf]  ;;  %v4005_v41 = vld [vmem:[%s6281_s1 + $0x28c] sm:$0xf0]  ;;  %v2838_v45 = vor.u32 %v3973_v39, %v2837_v37  ;;  %1463 = vmatpush.bf16.msra.mxu3 %v3110_v38  ;;  %v3951_v37 = vld [vmem:[%s6281_s1 + $0xe4] sm:$0xf] }
  0x10   :  { %v3093_v42 = vld [vmem:[%s6281_s1 + $0x380] sm:$0xf]  ;;  %v4037_v43 = vld [vmem:[%s6281_s1 + $0x38c] sm:$0xf0]  ;;  %v2966_v46 = vor.u32 %v4005_v41, %v2965_v40  ;;  %1425 = vmatpush.bf16.msra.mxu0 %v2710_v44  ;;  %v2759_v38 = vld [vmem:[%s6281_s1 + $0xf0] sm:$0xf0] }
  0x11   :  { %v2693_v47 = vld [vmem:[%s6281_s1 + $0x60] sm:$0xf]  ;;  %v3937_v48 = vld [vmem:[%s6281_s1 + $0x6c] sm:$0xf0]  ;;  %v3094_v50 = vor.u32 %v4037_v43, %v3093_v42  ;;  %1438 = vmatpush.bf16.msra.mxu1 %v2838_v45 }
  0x12   :  { %v2821_v49 = vld [vmem:[%s6281_s1 + $0x160] sm:$0xf]  ;;  %v3969_v51 = vld [vmem:[%s6281_s1 + $0x16c] sm:$0xf0]  ;;  %v2694_v56 = vor.u32 %v3937_v48, %v2693_v47  ;;  %1451 = vmatpush.bf16.msra.mxu2 %v2966_v46  ;;  %v2762_v46 = vor.u32 %v3951_v37, %v2759_v38 }
  0x13   :  { %v2949_v52 = vld [vmem:[%s6281_s1 + $0x260] sm:$0xf]  ;;  %v4001_v53 = vld [vmem:[%s6281_s1 + $0x26c] sm:$0xf0]  ;;  %v2822_v57 = vor.u32 %v3969_v51, %v2821_v49  ;;  %1464 = vmatpush.bf16.msra.mxu3 %v3094_v50  ;;  %v3947_v50 = vld [vmem:[%s6281_s1 + $0xc4] sm:$0xf] }
  0x14   :  { %v3077_v54 = vld [vmem:[%s6281_s1 + $0x360] sm:$0xf]  ;;  %v4033_v55 = vld [vmem:[%s6281_s1 + $0x36c] sm:$0xf0]  ;;  %v2950_v58 = vor.u32 %v4001_v53, %v2949_v52  ;;  %1426 = vmatpush.bf16.msra.mxu0 %v2694_v56  ;;  %v2743_v51 = vld [vmem:[%s6281_s1 + $0xd0] sm:$0xf0] }
  0x15   :  { %v2677_v59 = vld [vmem:[%s6281_s1 + $0x40] sm:$0xf]  ;;  %v3933_v60 = vld [vmem:[%s6281_s1 + $0x4c] sm:$0xf0]  ;;  %v3078_v62 = vor.u32 %v4033_v55, %v3077_v54  ;;  %1439 = vmatpush.bf16.msra.mxu1 %v2822_v57 }
  0x16   :  { %v2805_v61 = vld [vmem:[%s6281_s1 + $0x140] sm:$0xf]  ;;  %v3965_v63 = vld [vmem:[%s6281_s1 + $0x14c] sm:$0xf0]  ;;  %v2678_v4 = vor.u32 %v3933_v60, %v2677_v59  ;;  %1452 = vmatpush.bf16.msra.mxu2 %v2950_v58  ;;  %v2746_v59 = vor.u32 %v3947_v50, %v2743_v51 }
  0x17   :  { %v2933_v0 = vld [vmem:[%s6281_s1 + $0x240] sm:$0xf]  ;;  %v3997_v1 = vld [vmem:[%s6281_s1 + $0x24c] sm:$0xf0]  ;;  %v2806_v5 = vor.u32 %v3965_v63, %v2805_v61  ;;  %1465 = vmatpush.bf16.msra.mxu3 %v3078_v62  ;;  %v3943_v62 = vld [vmem:[%s6281_s1 + $0xa4] sm:$0xf] }
  0x18   :  { %v3061_v2 = vld [vmem:[%s6281_s1 + $0x340] sm:$0xf]  ;;  %v4029_v3 = vld [vmem:[%s6281_s1 + $0x34c] sm:$0xf0]  ;;  %v2934_v6 = vor.u32 %v3997_v1, %v2933_v0  ;;  %1427 = vmatpush.bf16.msra.mxu0 %v2678_v4  ;;  %v2727_v63 = vld [vmem:[%s6281_s1 + $0xb0] sm:$0xf0] }
  0x19   :  { %v2661_v7 = vld [vmem:[%s6281_s1 + $0x20] sm:$0xf]  ;;  %v3929_v8 = vld [vmem:[%s6281_s1 + $0x2c] sm:$0xf0]  ;;  %v3062_v10 = vor.u32 %v4029_v3, %v3061_v2  ;;  %1440 = vmatpush.bf16.msra.mxu1 %v2806_v5  ;;  %v40_v2 = vld [vmem:[%s6280_s0 + $0x8] sm:$0xff] }
  0x1a   :  { %v2789_v9 = vld [vmem:[%s6281_s1 + $0x120] sm:$0xf]  ;;  %v3961_v11 = vld [vmem:[%s6281_s1 + $0x12c] sm:$0xf0]  ;;  %v2662_v16 = vor.u32 %v3929_v8, %v2661_v7  ;;  %1453 = vmatpush.bf16.msra.mxu2 %v2934_v6  ;;  %v283_v8 = vunpack.c.l.b16 %v40_v2 }
  0x1b   :  { %v2917_v12 = vld [vmem:[%s6281_s1 + $0x220] sm:$0xf]  ;;  %v3993_v13 = vld [vmem:[%s6281_s1 + $0x22c] sm:$0xf0]  ;;  %v2790_v19 = vor.u32 %v3961_v11, %v2789_v9  ;;  %1466 = vmatpush.bf16.msra.mxu3 %v3062_v10  ;;  %v284_v10 = vunpack.c.h.b16 %v40_v2  ;;  %v2730_v11 = vor.u32 %v3943_v62, %v2727_v63 }
  0x1c   :  { %v3045_v14 = vld [vmem:[%s6281_s1 + $0x320] sm:$0xf]  ;;  %v4025_v15 = vld [vmem:[%s6281_s1 + $0x32c] sm:$0xf0]  ;;  %v2918_v20 = vor.u32 %v3993_v13, %v2917_v12  ;;  %1428 = vmatpush.bf16.msra.mxu0 %v2662_v16  ;;  %v3939_v16 = vld [vmem:[%s6281_s1 + $0x84] sm:$0xf] }
  0x1d   :  { %v2645_v17 = vld [vmem:[%s6281_s1] sm:$0xf]  ;;  %v3925_v18 = vld [vmem:[%s6281_s1 + $0xc] sm:$0xf0]  ;;  %v3046_v24 = vor.u32 %v4025_v15, %v3045_v14  ;;  %1441 = vmatpush.bf16.msra.mxu1 %v2790_v19 }
  0x1e   :  { %v2773_v21 = vld [vmem:[%s6281_s1 + $0x100] sm:$0xf]  ;;  %v3957_v22 = vld [vmem:[%s6281_s1 + $0x10c] sm:$0xf0]  ;;  %v2646_v31 = vor.u32 %v3925_v18, %v2645_v17  ;;  %1454 = vmatpush.bf16.msra.mxu2 %v2918_v20  ;;  %v2711_v17 = vld [vmem:[%s6281_s1 + $0x90] sm:$0xf0]  ;;  %v4632_v18 = vpack.c.b16 %v283_v8, %v283_v8  ;;  %v4636_v20 = vpack.c.b16 %v284_v10, %v284_v10 }
  0x1f   :  { %v2901_v23 = vld [vmem:[%s6281_s1 + $0x200] sm:$0xf]  ;;  %v3989_v25 = vld [vmem:[%s6281_s1 + $0x20c] sm:$0xf0]  ;;  %v2774_v35 = vor.u32 %v3957_v22, %v2773_v21  ;;  %1467 = vmatpush.bf16.msra.mxu3 %v3046_v24  ;;  %v3983_v8 = vld [vmem:[%s6281_s1 + $0x1e4] sm:$0xf] }
  0x20   :  { %v3029_v26 = vld [vmem:[%s6281_s1 + $0x300] sm:$0xf]  ;;  %v4021_v27 = vld [vmem:[%s6281_s1 + $0x30c] sm:$0xf0]  ;;  %v2902_v36 = vor.u32 %v3989_v25, %v2901_v23  ;;  %1429 = vmatpush.bf16.msra.mxu0 %v2646_v31  ;;  %v4015_v10 = vld [vmem:[%s6281_s1 + $0x2e4] sm:$0xf] }
  0x21   :  { %v3269_v28 = vld [vmem:[%s6281_s1 + $0x4e0] sm:$0xf]  ;;  %v4081_v29 = vld [vmem:[%s6281_s1 + $0x4ec] sm:$0xf0]  ;;  %v3030_v39 = vor.u32 %v4021_v27, %v3029_v26  ;;  %1442 = vmatpush.bf16.msra.mxu1 %v2774_v35 }
  0x22   :  { %v3397_v30 = vld [vmem:[%s6281_s1 + $0x5e0] sm:$0xf]  ;;  %v4113_v32 = vld [vmem:[%s6281_s1 + $0x5ec] sm:$0xf0]  ;;  %v3270_v40 = vor.u32 %v4081_v29, %v3269_v28  ;;  %1455 = vmatpush.bf16.msra.mxu2 %v2902_v36  ;;  %v2714_v28 = vor.u32 %v3939_v16, %v2711_v17 }
  0x23   :  { %v3525_v33 = vld [vmem:[%s6281_s1 + $0x6e0] sm:$0xf]  ;;  %v4145_v34 = vld [vmem:[%s6281_s1 + $0x6ec] sm:$0xf0]  ;;  %v3398_v41 = vor.u32 %v4113_v32, %v3397_v30  ;;  %1468 = vmatpush.bf16.msra.mxu3 %v3030_v39  ;;  %v3935_v32 = vld [vmem:[%s6281_s1 + $0x64] sm:$0xf] }
  0x24   :  { %v3526_v42 = vor.u32 %v4145_v34, %v3525_v33  ;;  %v3253_v43 = vld [vmem:[%s6281_s1 + $0x4c0] sm:$0xf]  ;;  %v4077_v44 = vld [vmem:[%s6281_s1 + $0x4cc] sm:$0xf0]  ;;  %1474 = vmatpush.bf16.msrb.mxu0 %v3270_v40  ;;  %v2695_v33 = vld [vmem:[%s6281_s1 + $0x70] sm:$0xf0] }
  0x25   :  { %v3381_v45 = vld [vmem:[%s6281_s1 + $0x5c0] sm:$0xf]  ;;  %v4109_v47 = vld [vmem:[%s6281_s1 + $0x5cc] sm:$0xf0]  ;;  %v3254_v52 = vor.u32 %v4077_v44, %v3253_v43  ;;  %1487 = vmatpush.bf16.msrb.mxu1 %v3398_v41  ;;  %1456 = vmatmul.bf16.vlgmr.msra.gmra.mxu2 %v4632_v18  ;;  %v2698_v40 = vor.u32 %v3935_v32, %v2695_v33  ;;  %v3931_v44 = vld [vmem:[%s6281_s1 + $0x44] sm:$0xf] }
  0x26   :  { %v3509_v48 = vld [vmem:[%s6281_s1 + $0x6c0] sm:$0xf]  ;;  %v4141_v49 = vld [vmem:[%s6281_s1 + $0x6cc] sm:$0xf0]  ;;  %1500 = vmatpush.bf16.msrb.mxu2 %v3526_v42  ;;  %v3382_v54 = vor.u32 %v4109_v47, %v3381_v45  ;;  %1469 = vmatmul.bf16.vlgmr.msra.gmra.mxu3 %v4636_v20  ;;  %v2679_v45 = vld [vmem:[%s6281_s1 + $0x50] sm:$0xf0] }
  0x27   :  { %v3237_v53 = vld [vmem:[%s6281_s1 + $0x4a0] sm:$0xf]  ;;  %v3510_v55 = vor.u32 %v4141_v49, %v3509_v48  ;;  %v4073_v56 = vld [vmem:[%s6281_s1 + $0x4ac] sm:$0xf0]  ;;  %1513 = vmatpush.bf16.msrb.mxu3 %v2762_v46  ;;  %v4011_v32 = vld [vmem:[%s6281_s1 + $0x2c4] sm:$0xf] }
  0x28   :  { %v3365_v57 = vld [vmem:[%s6281_s1 + $0x5a0] sm:$0xf]  ;;  %v4105_v58 = vld [vmem:[%s6281_s1 + $0x5ac] sm:$0xf0]  ;;  %1475 = vmatpush.bf16.msrb.mxu0 %v3254_v52  ;;  %v3238_v0 = vor.u32 %v4073_v56, %v3237_v53  ;;  %v2682_v52 = vor.u32 %v3931_v44, %v2679_v45  ;;  %v3927_v56 = vld [vmem:[%s6281_s1 + $0x24] sm:$0xf] }
  0x29   :  { %v3493_v60 = vld [vmem:[%s6281_s1 + $0x6a0] sm:$0xf]  ;;  %v4137_v61 = vld [vmem:[%s6281_s1 + $0x6ac] sm:$0xf0]  ;;  %v3366_v1 = vor.u32 %v4105_v58, %v3365_v57  ;;  %1488 = vmatpush.bf16.msrb.mxu1 %v3382_v54  ;;  %v2663_v57 = vld [vmem:[%s6281_s1 + $0x30] sm:$0xf0] }
  0x2a   :  { %v39_v3 = vld [vmem:[%s6280_s0] sm:$0xff]  ;;  %1501 = vmatpush.bf16.msrb.mxu2 %v3510_v55  ;;  %v3494_v4 = vor.u32 %v4137_v61, %v3493_v60  ;;  %v4069_v6 = vld [vmem:[%s6281_s1 + $0x48c] sm:$0xf0] }
  0x2b   :  { %v3221_v5 = vld [vmem:[%s6281_s1 + $0x480] sm:$0xf]  ;;  %v281_v9 = vunpack.c.l.b16 %v39_v3  ;;  %1514 = vmatpush.bf16.msrb.mxu3 %v2746_v59  ;;  %v4101_v12 = vld [vmem:[%s6281_s1 + $0x58c] sm:$0xf0]  ;;  %v282_v15 = vunpack.c.h.b16 %v39_v3  ;;  %v42_v3 = vld [vmem:[%s6280_s0 + $0x18] sm:$0xf] }
  0x2c   :  { %v3349_v7 = vld [vmem:[%s6281_s1 + $0x580] sm:$0xf]  ;;  %v4133_v14 = vld [vmem:[%s6281_s1 + $0x68c] sm:$0xf0]  ;;  %1476 = vmatpush.bf16.msrb.mxu0 %v3238_v0  ;;  %v3222_v21 = vor.u32 %v4069_v6, %v3221_v5  ;;  %v3923_v5 = vld [vmem:[%s6281_s1 + $0x4] sm:$0xf] }
  0x2d   :  { %v3477_v13 = vld [vmem:[%s6281_s1 + $0x680] sm:$0xf]  ;;  %v4634_v19 = vpack.c.b16 %v281_v9, %v281_v9  ;;  %v4638_v22 = vpack.c.b16 %v282_v15, %v282_v15  ;;  %1489 = vmatpush.bf16.msrb.mxu1 %v3366_v1  ;;  %v3350_v23 = vor.u32 %v4101_v12, %v3349_v7  ;;  %v4065_v26 = vld [vmem:[%s6281_s1 + $0x46c] sm:$0xf0]  ;;  %v2647_v6 = vld [vmem:[%s6281_s1 + $0x10] sm:$0xf0]  ;;  %v287_v15 = vunpack.c.l.b16 %v42_v3 }
  0x2e   :  { %1502 = vmatpush.bf16.msrb.mxu2 %v3494_v4  ;;  %v3478_v24 = vor.u32 %v4133_v14, %v3477_v13  ;;  %v3205_v25 = vld [vmem:[%s6281_s1 + $0x460] sm:$0xf]  ;;  %v4097_v29 = vld [vmem:[%s6281_s1 + $0x56c] sm:$0xf0]  ;;  %v2666_v4 = vor.u32 %v3927_v56, %v2663_v57  ;;  %v2887_v9 = vld [vmem:[%s6281_s1 + $0x1f0] sm:$0xf0] }
  0x2f   :  { %v3333_v27 = vld [vmem:[%s6281_s1 + $0x560] sm:$0xf]  ;;  %1515 = vmatpush.bf16.msrb.mxu3 %v2730_v11  ;;  %v4129_v31 = vld [vmem:[%s6281_s1 + $0x66c] sm:$0xf0]  ;;  %1430 = vmatmul.bf16.vlgmr.msra.gmra.mxu0 %v4634_v19  ;;  %v3206_v34 = vor.u32 %v4065_v26, %v3205_v25  ;;  %v3015_v12 = vld [vmem:[%s6281_s1 + $0x2f0] sm:$0xf0]  ;;  %v2650_v26 = vor.u32 %v3923_v5, %v2647_v6 }
  0x30   :  { %v3461_v30 = vld [vmem:[%s6281_s1 + $0x660] sm:$0xf]  ;;  %1477 = vmatpush.bf16.msrb.mxu0 %v3222_v21  ;;  %1443 = vmatmul.bf16.vlgmr.msra.gmra.mxu1 %v4638_v22  ;;  %v3334_v35 = vor.u32 %v4097_v29, %v3333_v27  ;;  %v4061_v38 = vld [vmem:[%s6281_s1 + $0x44c] sm:$0xf0]  ;;  %v4047_v13 = vld [vmem:[%s6281_s1 + $0x3e4] sm:$0xf]  ;;  %v2890_v27 = vor.u32 %v3983_v8, %v2887_v9 }
  0x31   :  { %1490 = vmatpush.bf16.msrb.mxu1 %v3350_v23  ;;  %v3462_v36 = vor.u32 %v4129_v31, %v3461_v30  ;;  %v3189_v37 = vld [vmem:[%s6281_s1 + $0x440] sm:$0xf]  ;;  %v4093_v41 = vld [vmem:[%s6281_s1 + $0x54c] sm:$0xf0]  ;;  %v3143_v14 = vld [vmem:[%s6281_s1 + $0x3f0] sm:$0xf0] }
  0x32   :  { %1503 = vmatpush.bf16.msrb.mxu2 %v3478_v24  ;;  %v3317_v39 = vld [vmem:[%s6281_s1 + $0x540] sm:$0xf]  ;;  %v4125_v43 = vld [vmem:[%s6281_s1 + $0x64c] sm:$0xf0]  ;;  %v3190_v46 = vor.u32 %v4061_v38, %v3189_v37  ;;  %v4079_v21 = vld [vmem:[%s6281_s1 + $0x4e4] sm:$0xf]  ;;  %v3146_v29 = vor.u32 %v4047_v13, %v3143_v14  ;;  %v4788_v37 = vpack.c.b16 %v287_v15, %v287_v15 }
  0x33   :  { %1516 = vmatpush.bf16.msrb.mxu3 %v2714_v28  ;;  %v3445_v42 = vld [vmem:[%s6281_s1 + $0x640] sm:$0xf]  ;;  %v3318_v47 = vor.u32 %v4093_v41, %v3317_v39  ;;  %v4057_v50 = vld [vmem:[%s6281_s1 + $0x42c] sm:$0xf0]  ;;  %v3271_v23 = vld [vmem:[%s6281_s1 + $0x4f0] sm:$0xf0]  ;;  %v3018_v28 = vor.u32 %v4015_v10, %v3015_v12 }
  0x34   :  { %1478 = vmatpush.bf16.msrb.mxu0 %v3206_v34  ;;  %v3446_v48 = vor.u32 %v4125_v43, %v3445_v42  ;;  %v3173_v49 = vld [vmem:[%s6281_s1 + $0x420] sm:$0xf]  ;;  %v4089_v53 = vld [vmem:[%s6281_s1 + $0x52c] sm:$0xf0]  ;;  %v3979_v30 = vld [vmem:[%s6281_s1 + $0x1c4] sm:$0xf]  ;;  %v3274_v33 = vor.u32 %v4079_v21, %v3271_v23 }
  0x35   :  { %1491 = vmatpush.bf16.msrb.mxu1 %v3334_v35  ;;  %v3301_v51 = vld [vmem:[%s6281_s1 + $0x520] sm:$0xf]  ;;  %v4121_v55 = vld [vmem:[%s6281_s1 + $0x62c] sm:$0xf0]  ;;  %v3174_v59 = vor.u32 %v4057_v50, %v3173_v49  ;;  %v2871_v31 = vld [vmem:[%s6281_s1 + $0x1d0] sm:$0xf0] }
  0x36   :  { %1504 = vmatpush.bf16.msrb.mxu2 %v3462_v36  ;;  %v3429_v54 = vld [vmem:[%s6281_s1 + $0x620] sm:$0xf]  ;;  %v4053_v60 = vld [vmem:[%s6281_s1 + $0x40c] sm:$0xf0]  ;;  %v3302_v63 = vor.u32 %v4089_v53, %v3301_v51  ;;  %v2999_v34 = vld [vmem:[%s6281_s1 + $0x2d0] sm:$0xf0]  ;;  %v2874_v42 = vor.u32 %v3979_v30, %v2871_v31 }
  0x37   :  { %1517 = vmatpush.bf16.msrb.mxu3 %v2698_v40  ;;  %v3157_v58 = vld [vmem:[%s6281_s1 + $0x400] sm:$0xf]  ;;  %v4085_v62 = vld [vmem:[%s6281_s1 + $0x50c] sm:$0xf0]  ;;  %v3430_v0 = vor.u32 %v4121_v55, %v3429_v54  ;;  %v4043_v35 = vld [vmem:[%s6281_s1 + $0x3c4] sm:$0xf]  ;;  %v3002_v43 = vor.u32 %v4011_v32, %v2999_v34 }
  0x38   :  { %1479 = vmatpush.bf16.msrb.mxu0 %v3190_v46  ;;  %v3285_v61 = vld [vmem:[%s6281_s1 + $0x500] sm:$0xf]  ;;  %v4117_v2 = vld [vmem:[%s6281_s1 + $0x60c] sm:$0xf0]  ;;  %v3158_v11 = vor.u32 %v4053_v60, %v3157_v58  ;;  %v3127_v36 = vld [vmem:[%s6281_s1 + $0x3d0] sm:$0xf0] }
  0x39   :  { %1492 = vmatpush.bf16.msrb.mxu1 %v3318_v47  ;;  %v3413_v1 = vld [vmem:[%s6281_s1 + $0x600] sm:$0xf]  ;;  %v41_v7 = vld [vmem:[%s6280_s0 + $0x10] sm:$0xff]  ;;  %v3286_v16 = vor.u32 %v4085_v62, %v3285_v61  ;;  %v4075_v38 = vld [vmem:[%s6281_s1 + $0x4c4] sm:$0xf]  ;;  %v3130_v44 = vor.u32 %v4043_v35, %v3127_v36 }
  0x3a   :  { %1505 = vmatpush.bf16.msrb.mxu2 %v3446_v48  ;;  %v3414_v17 = vor.u32 %v4117_v2, %v3413_v1  ;;  %v285_v24 = vunpack.c.l.b16 %v41_v7  ;;  %v286_v25 = vunpack.c.h.b16 %v41_v7  ;;  %v3255_v39 = vld [vmem:[%s6281_s1 + $0x4d0] sm:$0xf0]  ;;  %v3975_v45 = vld [vmem:[%s6281_s1 + $0x1a4] sm:$0xf] }
  0x3b   :  { %1518 = vmatpush.bf16.msrb.mxu3 %v2682_v52  ;;  %v2855_v46 = vld [vmem:[%s6281_s1 + $0x1b0] sm:$0xf0]  ;;  %v4007_v47 = vld [vmem:[%s6281_s1 + $0x2a4] sm:$0xf]  ;;  %v3258_v48 = vor.u32 %v4075_v38, %v3255_v39 }
  0x3c   :  { %1480 = vmatpush.bf16.msrb.mxu0 %v3174_v59  ;;  %v4796_v40 = vpack.c.b16 %v285_v24, %v285_v24  ;;  %v4798_v41 = vpack.c.b16 %v286_v25, %v286_v25  ;;  %v2983_v49 = vld [vmem:[%s6281_s1 + $0x2b0] sm:$0xf0]  ;;  %v4039_v50 = vld [vmem:[%s6281_s1 + $0x3a4] sm:$0xf]  ;;  %v2858_v54 = vor.u32 %v3975_v45, %v2855_v46 }
  0x3d   :  { %1493 = vmatpush.bf16.msrb.mxu1 %v3302_v63  ;;  %v3111_v51 = vld [vmem:[%s6281_s1 + $0x3b0] sm:$0xf0]  ;;  %v4071_v52 = vld [vmem:[%s6281_s1 + $0x4a4] sm:$0xf]  ;;  %v2986_v55 = vor.u32 %v4007_v47, %v2983_v49 }
  0x3e   :  { %1506 = vmatpush.bf16.msrb.mxu2 %v3430_v0  ;;  %v3239_v53 = vld [vmem:[%s6281_s1 + $0x4b0] sm:$0xf0]  ;;  %v3114_v56 = vor.u32 %v4039_v50, %v3111_v51  ;;  %v3971_v57 = vld [vmem:[%s6281_s1 + $0x184] sm:$0xf] }
  0x3f   :  { %1519 = vmatpush.bf16.msrb.mxu3 %v2666_v4  ;;  %v2839_v58 = vld [vmem:[%s6281_s1 + $0x190] sm:$0xf0]  ;;  %v4003_v59 = vld [vmem:[%s6281_s1 + $0x284] sm:$0xf]  ;;  %v3242_v60 = vor.u32 %v4071_v52, %v3239_v53 }
  0x40   :  { %1481 = vmatpush.bf16.msrb.mxu0 %v3158_v11  ;;  %v2967_v61 = vld [vmem:[%s6281_s1 + $0x290] sm:$0xf0]  ;;  %v4035_v62 = vld [vmem:[%s6281_s1 + $0x384] sm:$0xf]  ;;  %v2842_v2 = vor.u32 %v3971_v57, %v2839_v58 }
  0x41   :  { %1494 = vmatpush.bf16.msrb.mxu1 %v3286_v16  ;;  %v3095_v63 = vld [vmem:[%s6281_s1 + $0x390] sm:$0xf0]  ;;  %v4067_v0 = vld [vmem:[%s6281_s1 + $0x484] sm:$0xf]  ;;  %v2970_v3 = vor.u32 %v4003_v59, %v2967_v61 }
  0x42   :  { %1507 = vmatpush.bf16.msrb.mxu2 %v3414_v17  ;;  %v3223_v1 = vld [vmem:[%s6281_s1 + $0x490] sm:$0xf0]  ;;  %v3098_v4 = vor.u32 %v4035_v62, %v3095_v63  ;;  %v3967_v5 = vld [vmem:[%s6281_s1 + $0x164] sm:$0xf] }
  0x43   :  { %1520 = vmatpush.bf16.msrb.mxu3 %v2650_v26  ;;  %1482 = vmatmul.bf16.vlgmr.msrb.gmra.mxu0 %v4796_v40  ;;  %v2823_v6 = vld [vmem:[%s6281_s1 + $0x170] sm:$0xf0]  ;;  %v3999_v7 = vld [vmem:[%s6281_s1 + $0x264] sm:$0xf]  ;;  %v3226_v8 = vor.u32 %v4067_v0, %v3223_v1 }
  0x44   :  { %1526 = vmatpush.bf16.msra.mxu0 %v2890_v27  ;;  %1495 = vmatmul.bf16.vlgmr.msrb.gmra.mxu1 %v4798_v41  ;;  %v2951_v9 = vld [vmem:[%s6281_s1 + $0x270] sm:$0xf0]  ;;  %v4031_v10 = vld [vmem:[%s6281_s1 + $0x364] sm:$0xf]  ;;  %v2826_v14 = vor.u32 %v3967_v5, %v2823_v6 }
  0x45   :  { %1539 = vmatpush.bf16.msra.mxu1 %v3018_v28  ;;  %1508 = vmatmul.bf16.vlgmr.msrb.gmra.mxu2 %v4788_v37  ;;  %v3079_v11 = vld [vmem:[%s6281_s1 + $0x370] sm:$0xf0]  ;;  %v4063_v12 = vld [vmem:[%s6281_s1 + $0x464] sm:$0xf]  ;;  %v2954_v15 = vor.u32 %v3999_v7, %v2951_v9 }
  0x46   :  { %1552 = vmatpush.bf16.msra.mxu2 %v3146_v29  ;;  %1521 = vmatmul.bf16.vlgmr.msrb.gmra.mxu3 %v4634_v19  ;;  %v3207_v13 = vld [vmem:[%s6281_s1 + $0x470] sm:$0xf0]  ;;  %v3082_v16 = vor.u32 %v4031_v10, %v3079_v11  ;;  %v3963_v17 = vld [vmem:[%s6281_s1 + $0x144] sm:$0xf] }
  0x47   :  { %1565 = vmatpush.bf16.msra.mxu3 %v3274_v33  ;;  %v2807_v21 = vld [vmem:[%s6281_s1 + $0x150] sm:$0xf0]  ;;  %v3995_v23 = vld [vmem:[%s6281_s1 + $0x244] sm:$0xf]  ;;  %v3210_v24 = vor.u32 %v4063_v12, %v3207_v13 }
  0x48   :  { %1527 = vmatpush.bf16.msra.mxu0 %v2874_v42  ;;  %v2935_v25 = vld [vmem:[%s6281_s1 + $0x250] sm:$0xf0]  ;;  %v4027_v26 = vld [vmem:[%s6281_s1 + $0x344] sm:$0xf]  ;;  %v2810_v30 = vor.u32 %v3963_v17, %v2807_v21 }
  0x49   :  { %1540 = vmatpush.bf16.msra.mxu1 %v3002_v43  ;;  %v3063_v27 = vld [vmem:[%s6281_s1 + $0x350] sm:$0xf0]  ;;  %v4059_v28 = vld [vmem:[%s6281_s1 + $0x444] sm:$0xf]  ;;  %v2938_v32 = vor.u32 %v3995_v23, %v2935_v25 }
  0x4a   :  { %1553 = vmatpush.bf16.msra.mxu2 %v3130_v44  ;;  %v3191_v29 = vld [vmem:[%s6281_s1 + $0x450] sm:$0xf0]  ;;  %v3959_v31 = vld [vmem:[%s6281_s1 + $0x124] sm:$0xf]  ;;  %v3066_v33 = vor.u32 %v4027_v26, %v3063_v27 }
  0x4b   :  { %1566 = vmatpush.bf16.msra.mxu3 %v3258_v48  ;;  %v2791_v34 = vld [vmem:[%s6281_s1 + $0x130] sm:$0xf0]  ;;  %v3991_v35 = vld [vmem:[%s6281_s1 + $0x224] sm:$0xf]  ;;  %v3194_v38 = vor.u32 %v4059_v28, %v3191_v29 }
  0x4c   :  { %1528 = vmatpush.bf16.msra.mxu0 %v2858_v54  ;;  %v2919_v36 = vld [vmem:[%s6281_s1 + $0x230] sm:$0xf0]  ;;  %v4023_v39 = vld [vmem:[%s6281_s1 + $0x324] sm:$0xf] }
  0x4d   :  { %1541 = vmatpush.bf16.msra.mxu1 %v2986_v55  ;;  %v3047_v42 = vld [vmem:[%s6281_s1 + $0x330] sm:$0xf0]  ;;  %v4055_v43 = vld [vmem:[%s6281_s1 + $0x424] sm:$0xf] }
  0x4e   :  { %1554 = vmatpush.bf16.msra.mxu2 %v3114_v56  ;;  %v3175_v44 = vld [vmem:[%s6281_s1 + $0x430] sm:$0xf0] }
  0x4f   :  { %1567 = vmatpush.bf16.msra.mxu3 %v3242_v60 }
  0x50   :  { %1529 = vmatpush.bf16.msra.mxu0 %v2842_v2 }
  0x51   :  { %1542 = vmatpush.bf16.msra.mxu1 %v2970_v3 }
  0x52   :  { %1555 = vmatpush.bf16.msra.mxu2 %v3098_v4 }
  0x53   :  { %1568 = vmatpush.bf16.msra.mxu3 %v3226_v8 }
  0x54   :  { %1530 = vmatpush.bf16.msra.mxu0 %v2826_v14 }
  0x55   :  { %1543 = vmatpush.bf16.msra.mxu1 %v2954_v15 }
  0x56   :  { %1556 = vmatpush.bf16.msra.mxu2 %v3082_v16 }
  0x57   :  { %1569 = vmatpush.bf16.msra.mxu3 %v3210_v24 }
  0x58   :  { %16 = vsyncpa [#allocation3], 0  ;;  %1531 = vmatpush.bf16.msra.mxu0 %v2810_v30  ;;  %v2794_v45 = vor.u32 %v3959_v31, %v2791_v34  ;;  %v3955_v46 = vld [vmem:[%s6281_s1 + $0x104] sm:$0xf]  ;;  %v2775_v47 = vld [vmem:[%s6281_s1 + $0x110] sm:$0xf0]  ;;  %v2922_v48 = vor.u32 %v3991_v35, %v2919_v36  ;;  %v3050_v49 = vor.u32 %v4023_v39, %v3047_v42  ;;  %v3178_v53 = vor.u32 %v4055_v43, %v3175_v44 }
  0x59   :  { %1544 = vmatpush.bf16.msra.mxu1 %v2938_v32  ;;  %v3987_v50 = vld [vmem:[%s6281_s1 + $0x204] sm:$0xf]  ;;  %v2903_v51 = vld [vmem:[%s6281_s1 + $0x210] sm:$0xf0]  ;;  %v2778_v60 = vor.u32 %v3955_v46, %v2775_v47  ;;  %v2765_v62 = vld [vmem:[%s6281_s1 + $0xe8] sm:$0xf] }
  0x5a   :  { %1557 = vmatpush.bf16.msra.mxu2 %v3066_v33  ;;  %v4019_v52 = vld [vmem:[%s6281_s1 + $0x304] sm:$0xf]  ;;  %v3031_v54 = vld [vmem:[%s6281_s1 + $0x310] sm:$0xf0]  ;;  %v3954_v63 = vld [vmem:[%s6281_s1 + $0xf4] sm:$0xf0]  ;;  %v2906_v0 = vor.u32 %v3987_v50, %v2903_v51 }
  0x5b   :  { %1570 = vmatpush.bf16.msra.mxu3 %v3194_v38  ;;  %v4051_v55 = vld [vmem:[%s6281_s1 + $0x404] sm:$0xf]  ;;  %v3159_v56 = vld [vmem:[%s6281_s1 + $0x410] sm:$0xf0]  ;;  %v3034_v1 = vor.u32 %v4019_v52, %v3031_v54  ;;  %v2893_v2 = vld [vmem:[%s6281_s1 + $0x1e8] sm:$0xf]  ;;  %v2766_v7 = vor.u32 %v3954_v63, %v2765_v62 }
  0x5c   :  { %v4111_v57 = vld [vmem:[%s6281_s1 + $0x5e4] sm:$0xf]  ;;  %v3399_v58 = vld [vmem:[%s6281_s1 + $0x5f0] sm:$0xf0]  ;;  %1532 = vmatpush.bf16.msra.mxu0 %v2794_v45  ;;  %v3986_v3 = vld [vmem:[%s6281_s1 + $0x1f4] sm:$0xf0]  ;;  %v3162_v4 = vor.u32 %v4051_v55, %v3159_v56 }
  0x5d   :  { %v4143_v59 = vld [vmem:[%s6281_s1 + $0x6e4] sm:$0xf]  ;;  %v3527_v61 = vld [vmem:[%s6281_s1 + $0x6f0] sm:$0xf0]  ;;  %1545 = vmatpush.bf16.msra.mxu1 %v2922_v48  ;;  %v3402_v5 = vor.u32 %v4111_v57, %v3399_v58  ;;  %v2894_v11 = vor.u32 %v3986_v3, %v2893_v2  ;;  %v2749_v13 = vld [vmem:[%s6281_s1 + $0xc8] sm:$0xf] }
  0x5e   :  { %1558 = vmatpush.bf16.msra.mxu2 %v3050_v49  ;;  %v3530_v6 = vor.u32 %v4143_v59, %v3527_v61  ;;  %v4107_v8 = vld [vmem:[%s6281_s1 + $0x5c4] sm:$0xf]  ;;  %v3383_v9 = vld [vmem:[%s6281_s1 + $0x5d0] sm:$0xf0]  ;;  %v3950_v14 = vld [vmem:[%s6281_s1 + $0xd4] sm:$0xf0] }
  0x5f   :  { %1571 = vmatpush.bf16.msra.mxu3 %v3178_v53  ;;  %v4139_v10 = vld [vmem:[%s6281_s1 + $0x6c4] sm:$0xf]  ;;  %v3511_v12 = vld [vmem:[%s6281_s1 + $0x6d0] sm:$0xf0]  ;;  %v2877_v15 = vld [vmem:[%s6281_s1 + $0x1c8] sm:$0xf]  ;;  %v3386_v17 = vor.u32 %v4107_v8, %v3383_v9  ;;  %v2750_v23 = vor.u32 %v3950_v14, %v2749_v13 }
  0x60   :  { %1533 = vmatpush.bf16.msra.mxu0 %v2778_v60  ;;  %v3982_v16 = vld [vmem:[%s6281_s1 + $0x1d4] sm:$0xf0]  ;;  %v3514_v21 = vor.u32 %v4139_v10, %v3511_v12  ;;  %v4103_v24 = vld [vmem:[%s6281_s1 + $0x5a4] sm:$0xf]  ;;  %v3367_v25 = vld [vmem:[%s6281_s1 + $0x5b0] sm:$0xf0] }
  0x61   :  { %1546 = vmatpush.bf16.msra.mxu1 %v2906_v0  ;;  %v4135_v26 = vld [vmem:[%s6281_s1 + $0x6a4] sm:$0xf]  ;;  %v2878_v27 = vor.u32 %v3982_v16, %v2877_v15  ;;  %v3495_v28 = vld [vmem:[%s6281_s1 + $0x6b0] sm:$0xf0]  ;;  %v2733_v29 = vld [vmem:[%s6281_s1 + $0xa8] sm:$0xf]  ;;  %v3370_v33 = vor.u32 %v4103_v24, %v3367_v25 }
  0x62   :  { %1559 = vmatpush.bf16.msra.mxu2 %v3034_v1  ;;  %v3946_v30 = vld [vmem:[%s6281_s1 + $0xb4] sm:$0xf0]  ;;  %v2861_v31 = vld [vmem:[%s6281_s1 + $0x1a8] sm:$0xf]  ;;  %v3498_v34 = vor.u32 %v4135_v26, %v3495_v28  ;;  %v4099_v36 = vld [vmem:[%s6281_s1 + $0x584] sm:$0xf] }
  0x63   :  { %1572 = vmatpush.bf16.msra.mxu3 %v3162_v4  ;;  %v3978_v32 = vld [vmem:[%s6281_s1 + $0x1b4] sm:$0xf0]  ;;  %1534 = vmatmul.bf16.vlgmr.msra.gmra.mxu0 %v4638_v22  ;;  %v2734_v35 = vor.u32 %v3946_v30, %v2733_v29  ;;  %v3351_v38 = vld [vmem:[%s6281_s1 + $0x590] sm:$0xf0]  ;;  %v4131_v39 = vld [vmem:[%s6281_s1 + $0x684] sm:$0xf] }
  0x64   :  { %1578 = vmatpush.bf16.msrb.mxu0 %v3402_v5  ;;  %1547 = vmatmul.bf16.vlgmr.msra.gmra.mxu1 %v4632_v18  ;;  %v2862_v42 = vor.u32 %v3978_v32, %v2861_v31  ;;  %v3479_v43 = vld [vmem:[%s6281_s1 + $0x690] sm:$0xf0]  ;;  %v2717_v44 = vld [vmem:[%s6281_s1 + $0x88] sm:$0xf]  ;;  %v3942_v45 = vld [vmem:[%s6281_s1 + $0x94] sm:$0xf0]  ;;  %v3354_v48 = vor.u32 %v4099_v36, %v3351_v38 }
  0x65   :  { %1591 = vmatpush.bf16.msrb.mxu1 %v3530_v6  ;;  %1560 = vmatmul.bf16.vlgmr.msra.gmra.mxu2 %v4636_v20  ;;  %v2845_v46 = vld [vmem:[%s6281_s1 + $0x188] sm:$0xf]  ;;  %v3974_v47 = vld [vmem:[%s6281_s1 + $0x194] sm:$0xf0]  ;;  %v3482_v49 = vor.u32 %v4131_v39, %v3479_v43  ;;  %v2718_v50 = vor.u32 %v3942_v45, %v2717_v44  ;;  %v4095_v51 = vld [vmem:[%s6281_s1 + $0x564] sm:$0xf] }
  0x66   :  { %1604 = vmatpush.bf16.msrb.mxu2 %v2766_v7  ;;  %1573 = vmatmul.bf16.vlgmr.msra.gmra.mxu3 %v4796_v40  ;;  %v3335_v52 = vld [vmem:[%s6281_s1 + $0x570] sm:$0xf0]  ;;  %v4127_v53 = vld [vmem:[%s6281_s1 + $0x664] sm:$0xf]  ;;  %v2846_v54 = vor.u32 %v3974_v47, %v2845_v46  ;;  %v2701_v56 = vld [vmem:[%s6281_s1 + $0x68] sm:$0xf] }
  0x67   :  { %1617 = vmatpush.bf16.msrb.mxu3 %v2894_v11  ;;  %v3463_v55 = vld [vmem:[%s6281_s1 + $0x670] sm:$0xf0]  ;;  %v3938_v57 = vld [vmem:[%s6281_s1 + $0x74] sm:$0xf0]  ;;  %v2829_v58 = vld [vmem:[%s6281_s1 + $0x168] sm:$0xf]  ;;  %v3338_v60 = vor.u32 %v4095_v51, %v3335_v52 }
  0x68   :  { %1579 = vmatpush.bf16.msrb.mxu0 %v3386_v17  ;;  %v3970_v59 = vld [vmem:[%s6281_s1 + $0x174] sm:$0xf0]  ;;  %v3466_v61 = vor.u32 %v4127_v53, %v3463_v55  ;;  %v2702_v62 = vor.u32 %v3938_v57, %v2701_v56  ;;  %v4091_v63 = vld [vmem:[%s6281_s1 + $0x544] sm:$0xf]  ;;  %v3319_v0 = vld [vmem:[%s6281_s1 + $0x550] sm:$0xf0] }
  0x69   :  { %1592 = vmatpush.bf16.msrb.mxu1 %v3514_v21  ;;  %v4123_v1 = vld [vmem:[%s6281_s1 + $0x644] sm:$0xf]  ;;  %v2830_v2 = vor.u32 %v3970_v59, %v2829_v58  ;;  %v3447_v3 = vld [vmem:[%s6281_s1 + $0x650] sm:$0xf0]  ;;  %v2685_v4 = vld [vmem:[%s6281_s1 + $0x48] sm:$0xf]  ;;  %v3322_v8 = vor.u32 %v4091_v63, %v3319_v0 }
  0x6a   :  { %1605 = vmatpush.bf16.msrb.mxu2 %v2750_v23  ;;  %v3934_v5 = vld [vmem:[%s6281_s1 + $0x54] sm:$0xf0]  ;;  %v2813_v6 = vld [vmem:[%s6281_s1 + $0x148] sm:$0xf]  ;;  %v3450_v9 = vor.u32 %v4123_v1, %v3447_v3  ;;  %v4087_v11 = vld [vmem:[%s6281_s1 + $0x524] sm:$0xf] }
  0x6b   :  { %1618 = vmatpush.bf16.msrb.mxu3 %v2878_v27  ;;  %v3966_v7 = vld [vmem:[%s6281_s1 + $0x154] sm:$0xf0]  ;;  %v2686_v10 = vor.u32 %v3934_v5, %v2685_v4  ;;  %v3303_v12 = vld [vmem:[%s6281_s1 + $0x530] sm:$0xf0]  ;;  %v4119_v13 = vld [vmem:[%s6281_s1 + $0x624] sm:$0xf] }
  0x6c   :  { %1580 = vmatpush.bf16.msrb.mxu0 %v3370_v33  ;;  %v2814_v14 = vor.u32 %v3966_v7, %v2813_v6  ;;  %v3431_v15 = vld [vmem:[%s6281_s1 + $0x630] sm:$0xf0]  ;;  %v2669_v16 = vld [vmem:[%s6281_s1 + $0x28] sm:$0xf]  ;;  %v3930_v17 = vld [vmem:[%s6281_s1 + $0x34] sm:$0xf0]  ;;  %v3306_v24 = vor.u32 %v4087_v11, %v3303_v12 }
  0x6d   :  { %1593 = vmatpush.bf16.msrb.mxu1 %v3498_v34  ;;  %v2797_v21 = vld [vmem:[%s6281_s1 + $0x128] sm:$0xf]  ;;  %v3962_v23 = vld [vmem:[%s6281_s1 + $0x134] sm:$0xf0]  ;;  %v4083_v25 = vld [vmem:[%s6281_s1 + $0x504] sm:$0xf]  ;;  %v3434_v27 = vor.u32 %v4119_v13, %v3431_v15  ;;  %v2670_v28 = vor.u32 %v3930_v17, %v2669_v16 }
  0x6e   :  { %1606 = vmatpush.bf16.msrb.mxu2 %v2734_v35  ;;  %v3287_v26 = vld [vmem:[%s6281_s1 + $0x510] sm:$0xf0]  ;;  %v4115_v29 = vld [vmem:[%s6281_s1 + $0x604] sm:$0xf]  ;;  %v2653_v31 = vld [vmem:[%s6281_s1 + $0x8] sm:$0xf]  ;;  %v2798_v32 = vor.u32 %v3962_v23, %v2797_v21 }
  0x6f   :  { %1619 = vmatpush.bf16.msrb.mxu3 %v2862_v42  ;;  %v3415_v30 = vld [vmem:[%s6281_s1 + $0x610] sm:$0xf0]  ;;  %v3926_v33 = vld [vmem:[%s6281_s1 + $0x14] sm:$0xf0]  ;;  %v2781_v34 = vld [vmem:[%s6281_s1 + $0x108] sm:$0xf]  ;;  %v3290_v42 = vor.u32 %v4083_v25, %v3287_v26 }
  0x70   :  { %1581 = vmatpush.bf16.msrb.mxu0 %v3354_v48  ;;  %v3958_v35 = vld [vmem:[%s6281_s1 + $0x114] sm:$0xf0]  ;;  %v3021_v36 = vld [vmem:[%s6281_s1 + $0x2e8] sm:$0xf]  ;;  %v3418_v46 = vor.u32 %v4115_v29, %v3415_v30  ;;  %v2654_v47 = vor.u32 %v3926_v33, %v2653_v31  ;;  %s2634_s25 = sshll.u32 %s6291_s11, 4  ;;  %s2635_s25 = int_to_ptr.hbm [resolvable:$true] %s2634_s25 }
  0x71   :  { %1594 = vmatpush.bf16.msrb.mxu1 %v3482_v49  ;;  %v4018_v38 = vld [vmem:[%s6281_s1 + $0x2f4] sm:$0xf0]  ;;  %v3149_v39 = vld [vmem:[%s6281_s1 + $0x3e8] sm:$0xf] }
  0x72   :  { %1607 = vmatpush.bf16.msrb.mxu2 %v2718_v50  ;;  %v4050_v43 = vld [vmem:[%s6281_s1 + $0x3f4] sm:$0xf0]  ;;  %v3277_v44 = vld [vmem:[%s6281_s1 + $0x4e8] sm:$0xf]  ;;  %v2782_v50 = vor.u32 %v3958_v35, %v2781_v34  ;;  %v3022_v51 = vor.u32 %v4018_v38, %v3021_v36 }
  0x73   :  { %1620 = vmatpush.bf16.msrb.mxu3 %v2846_v54  ;;  %v4082_v45 = vld [vmem:[%s6281_s1 + $0x4f4] sm:$0xf0]  ;;  %v3405_v48 = vld [vmem:[%s6281_s1 + $0x5e8] sm:$0xf]  ;;  %v3150_v52 = vor.u32 %v4050_v43, %v3149_v39 }
  0x74   :  { %1582 = vmatpush.bf16.msrb.mxu0 %v3338_v60  ;;  %v4114_v49 = vld [vmem:[%s6281_s1 + $0x5f4] sm:$0xf0]  ;;  %v3278_v53 = vor.u32 %v4082_v45, %v3277_v44  ;;  %v3005_v54 = vld [vmem:[%s6281_s1 + $0x2c8] sm:$0xf] }
  0x75   :  { %1595 = vmatpush.bf16.msrb.mxu1 %v3466_v61  ;;  %v4014_v55 = vld [vmem:[%s6281_s1 + $0x2d4] sm:$0xf0]  ;;  %v3133_v56 = vld [vmem:[%s6281_s1 + $0x3c8] sm:$0xf]  ;;  %v3406_v57 = vor.u32 %v4114_v49, %v3405_v48 }
  0x76   :  { %1608 = vmatpush.bf16.msrb.mxu2 %v2702_v62  ;;  %v4046_v58 = vld [vmem:[%s6281_s1 + $0x3d4] sm:$0xf0]  ;;  %v3261_v59 = vld [vmem:[%s6281_s1 + $0x4c8] sm:$0xf]  ;;  %v3006_v63 = vor.u32 %v4014_v55, %v3005_v54 }
  0x77   :  { %1621 = vmatpush.bf16.msrb.mxu3 %v2830_v2  ;;  %v4078_v60 = vld [vmem:[%s6281_s1 + $0x4d4] sm:$0xf0]  ;;  %v3389_v61 = vld [vmem:[%s6281_s1 + $0x5c8] sm:$0xf]  ;;  %v3134_v0 = vor.u32 %v4046_v58, %v3133_v56 }
  0x78   :  { %1583 = vmatpush.bf16.msrb.mxu0 %v3322_v8  ;;  %v4110_v62 = vld [vmem:[%s6281_s1 + $0x5d4] sm:$0xf0]  ;;  %v3262_v1 = vor.u32 %v4078_v60, %v3261_v59  ;;  %v2989_v2 = vld [vmem:[%s6281_s1 + $0x2a8] sm:$0xf] }
  0x79   :  { %1596 = vmatpush.bf16.msrb.mxu1 %v3450_v9  ;;  %v4010_v3 = vld [vmem:[%s6281_s1 + $0x2b4] sm:$0xf0]  ;;  %v3117_v4 = vld [vmem:[%s6281_s1 + $0x3a8] sm:$0xf]  ;;  %v3390_v5 = vor.u32 %v4110_v62, %v3389_v61 }
  0x7a   :  { %1609 = vmatpush.bf16.msrb.mxu2 %v2686_v10  ;;  %v4042_v6 = vld [vmem:[%s6281_s1 + $0x3b4] sm:$0xf0]  ;;  %v3245_v7 = vld [vmem:[%s6281_s1 + $0x4a8] sm:$0xf]  ;;  %v2990_v11 = vor.u32 %v4010_v3, %v2989_v2 }
  0x7b   :  { %1622 = vmatpush.bf16.msrb.mxu3 %v2814_v14  ;;  %v4074_v8 = vld [vmem:[%s6281_s1 + $0x4b4] sm:$0xf0]  ;;  %v3373_v9 = vld [vmem:[%s6281_s1 + $0x5a8] sm:$0xf]  ;;  %v3118_v12 = vor.u32 %v4042_v6, %v3117_v4 }
  0x7c   :  { %1584 = vmatpush.bf16.msrb.mxu0 %v3306_v24  ;;  %v4106_v10 = vld [vmem:[%s6281_s1 + $0x5b4] sm:$0xf0]  ;;  %v3246_v13 = vor.u32 %v4074_v8, %v3245_v7  ;;  %v2973_v14 = vld [vmem:[%s6281_s1 + $0x288] sm:$0xf] }
  0x7d   :  { %1597 = vmatpush.bf16.msrb.mxu1 %v3434_v27  ;;  %v4006_v15 = vld [vmem:[%s6281_s1 + $0x294] sm:$0xf0]  ;;  %v3101_v16 = vld [vmem:[%s6281_s1 + $0x388] sm:$0xf]  ;;  %v3374_v17 = vor.u32 %v4106_v10, %v3373_v9 }
  0x7e   :  { %1610 = vmatpush.bf16.msrb.mxu2 %v2670_v28  ;;  %v4038_v21 = vld [vmem:[%s6281_s1 + $0x394] sm:$0xf0]  ;;  %v3229_v23 = vld [vmem:[%s6281_s1 + $0x488] sm:$0xf]  ;;  %v2974_v27 = vor.u32 %v4006_v15, %v2973_v14 }
  0x7f   :  { %1623 = vmatpush.bf16.msrb.mxu3 %v2798_v32  ;;  %v4070_v24 = vld [vmem:[%s6281_s1 + $0x494] sm:$0xf0]  ;;  %v3357_v25 = vld [vmem:[%s6281_s1 + $0x588] sm:$0xf]  ;;  %v3102_v28 = vor.u32 %v4038_v21, %v3101_v16  ;;  %v3952_v16 = vld [vmem:[%s6281_s1 + $0xec] sm:$0xf] }
  0x80   :  { %1585 = vmatpush.bf16.msrb.mxu0 %v3290_v42  ;;  %v4102_v26 = vld [vmem:[%s6281_s1 + $0x594] sm:$0xf0]  ;;  %v3230_v29 = vor.u32 %v4070_v24, %v3229_v23  ;;  %v2957_v30 = vld [vmem:[%s6281_s1 + $0x268] sm:$0xf]  ;;  %v2767_v21 = vld [vmem:[%s6281_s1 + $0xf8] sm:$0xf0] }
  0x81   :  { %1598 = vmatpush.bf16.msrb.mxu1 %v3418_v46  ;;  %v4002_v31 = vld [vmem:[%s6281_s1 + $0x274] sm:$0xf0]  ;;  %v3085_v32 = vld [vmem:[%s6281_s1 + $0x368] sm:$0xf]  ;;  %v3358_v33 = vor.u32 %v4102_v26, %v3357_v25  ;;  %v3984_v23 = vld [vmem:[%s6281_s1 + $0x1ec] sm:$0xf] }
  0x82   :  { %1611 = vmatpush.bf16.msrb.mxu2 %v2654_v47  ;;  %v4034_v34 = vld [vmem:[%s6281_s1 + $0x374] sm:$0xf0]  ;;  %v3213_v35 = vld [vmem:[%s6281_s1 + $0x468] sm:$0xf]  ;;  %v2958_v42 = vor.u32 %v4002_v31, %v2957_v30  ;;  %v2895_v24 = vld [vmem:[%s6281_s1 + $0x1f8] sm:$0xf0]  ;;  %v2770_v31 = vor.u32 %v3952_v16, %v2767_v21 }
  0x83   :  { %1624 = vmatpush.bf16.msrb.mxu3 %v2782_v50  ;;  %1586 = vmatmul.bf16.vlgmr.msrb.gmra.mxu0 %v4798_v41  ;;  %v4066_v36 = vld [vmem:[%s6281_s1 + $0x474] sm:$0xf0]  ;;  %v3341_v38 = vld [vmem:[%s6281_s1 + $0x568] sm:$0xf]  ;;  %v3086_v43 = vor.u32 %v4034_v34, %v3085_v32  ;;  %v2898_v32 = vor.u32 %v3984_v23, %v2895_v24  ;;  %v2959_v16 = vld [vmem:[%s6281_s1 + $0x278] sm:$0xf0] }
  0x84   :  { %1630 = vmatpush.bf16.msra.mxu0 %v3022_v51  ;;  %1599 = vmatmul.bf16.vlgmr.msrb.gmra.mxu1 %v4788_v37  ;;  %v4098_v39 = vld [vmem:[%s6281_s1 + $0x574] sm:$0xf0]  ;;  %v3214_v44 = vor.u32 %v4066_v36, %v3213_v35  ;;  %v2941_v45 = vld [vmem:[%s6281_s1 + $0x248] sm:$0xf]  ;;  %v3948_v35 = vld [vmem:[%s6281_s1 + $0xcc] sm:$0xf] }
  0x85   :  { %1643 = vmatpush.bf16.msra.mxu1 %v3150_v52  ;;  %1612 = vmatmul.bf16.vlgmr.msrb.gmra.mxu2 %v4634_v19  ;;  %v3998_v46 = vld [vmem:[%s6281_s1 + $0x254] sm:$0xf0]  ;;  %v3069_v47 = vld [vmem:[%s6281_s1 + $0x348] sm:$0xf]  ;;  %v3342_v48 = vor.u32 %v4098_v39, %v3341_v38  ;;  %v2751_v38 = vld [vmem:[%s6281_s1 + $0xd8] sm:$0xf0] }
  0x86   :  { %1656 = vmatpush.bf16.msra.mxu2 %v3278_v53  ;;  %1625 = vmatmul.bf16.vlgmr.msrb.gmra.mxu3 %v4638_v22  ;;  %v4030_v49 = vld [vmem:[%s6281_s1 + $0x354] sm:$0xf0]  ;;  %v3197_v50 = vld [vmem:[%s6281_s1 + $0x448] sm:$0xf]  ;;  %v2942_v54 = vor.u32 %v3998_v46, %v2941_v45  ;;  %v3980_v39 = vld [vmem:[%s6281_s1 + $0x1cc] sm:$0xf]  ;;  %v2754_v46 = vor.u32 %v3948_v35, %v2751_v38 }
  0x87   :  { %1669 = vmatpush.bf16.msra.mxu3 %v3406_v57  ;;  %v4062_v51 = vld [vmem:[%s6281_s1 + $0x454] sm:$0xf0]  ;;  %v3325_v52 = vld [vmem:[%s6281_s1 + $0x548] sm:$0xf]  ;;  %v3070_v55 = vor.u32 %v4030_v49, %v3069_v47 }
  0x88   :  { %1631 = vmatpush.bf16.msra.mxu0 %v3006_v63  ;;  %v4094_v53 = vld [vmem:[%s6281_s1 + $0x554] sm:$0xf0]  ;;  %v3198_v56 = vor.u32 %v4062_v51, %v3197_v50  ;;  %v2925_v57 = vld [vmem:[%s6281_s1 + $0x228] sm:$0xf]  ;;  %v3944_v50 = vld [vmem:[%s6281_s1 + $0xac] sm:$0xf] }
  0x89   :  { %1644 = vmatpush.bf16.msra.mxu1 %v3134_v0  ;;  %v3994_v58 = vld [vmem:[%s6281_s1 + $0x234] sm:$0xf0]  ;;  %v3053_v59 = vld [vmem:[%s6281_s1 + $0x328] sm:$0xf]  ;;  %v3326_v60 = vor.u32 %v4094_v53, %v3325_v52  ;;  %v2735_v52 = vld [vmem:[%s6281_s1 + $0xb8] sm:$0xf0] }
  0x8a   :  { %1657 = vmatpush.bf16.msra.mxu2 %v3262_v1  ;;  %v4026_v61 = vld [vmem:[%s6281_s1 + $0x334] sm:$0xf0]  ;;  %v3181_v62 = vld [vmem:[%s6281_s1 + $0x428] sm:$0xf]  ;;  %v2926_v2 = vor.u32 %v3994_v58, %v2925_v57  ;;  %v3976_v53 = vld [vmem:[%s6281_s1 + $0x1ac] sm:$0xf]  ;;  %v2738_v58 = vor.u32 %v3944_v50, %v2735_v52 }
  0x8b   :  { %1670 = vmatpush.bf16.msra.mxu3 %v3390_v5  ;;  %v4058_v63 = vld [vmem:[%s6281_s1 + $0x434] sm:$0xf0]  ;;  %v3309_v0 = vld [vmem:[%s6281_s1 + $0x528] sm:$0xf]  ;;  %v3054_v5 = vor.u32 %v4026_v61, %v3053_v59 }
  0x8c   :  { %1632 = vmatpush.bf16.msra.mxu0 %v2990_v11  ;;  %v4090_v1 = vld [vmem:[%s6281_s1 + $0x534] sm:$0xf0]  ;;  %v2909_v3 = vld [vmem:[%s6281_s1 + $0x208] sm:$0xf]  ;;  %v3182_v6 = vor.u32 %v4058_v63, %v3181_v62  ;;  %v3940_v62 = vld [vmem:[%s6281_s1 + $0x8c] sm:$0xf] }
  0x8d   :  { %1645 = vmatpush.bf16.msra.mxu1 %v3118_v12  ;;  %v3990_v4 = vld [vmem:[%s6281_s1 + $0x214] sm:$0xf0]  ;;  %v3037_v7 = vld [vmem:[%s6281_s1 + $0x308] sm:$0xf]  ;;  %v3310_v10 = vor.u32 %v4090_v1, %v3309_v0  ;;  %v2719_v0 = vld [vmem:[%s6281_s1 + $0x98] sm:$0xf0] }
  0x8e   :  { %1658 = vmatpush.bf16.msra.mxu2 %v3246_v13  ;;  %v4022_v8 = vld [vmem:[%s6281_s1 + $0x314] sm:$0xf0]  ;;  %v3165_v9 = vld [vmem:[%s6281_s1 + $0x408] sm:$0xf]  ;;  %v3972_v1 = vld [vmem:[%s6281_s1 + $0x18c] sm:$0xf] }
  0x8f   :  { %1671 = vmatpush.bf16.msra.mxu3 %v3374_v17  ;;  %v4054_v11 = vld [vmem:[%s6281_s1 + $0x414] sm:$0xf0]  ;;  %v3293_v12 = vld [vmem:[%s6281_s1 + $0x508] sm:$0xf]  ;;  %v2910_v17 = vor.u32 %v3990_v4, %v2909_v3  ;;  %v3038_v25 = vor.u32 %v4022_v8, %v3037_v7  ;;  %v4004_v3 = vld [vmem:[%s6281_s1 + $0x28c] sm:$0xf] }
  0x90   :  { %1633 = vmatpush.bf16.msra.mxu0 %v2974_v27  ;;  %v4086_v13 = vld [vmem:[%s6281_s1 + $0x514] sm:$0xf0]  ;;  %v3533_v14 = vld [vmem:[%s6281_s1 + $0x6e8] sm:$0xf]  ;;  %v3166_v26 = vor.u32 %v4054_v11, %v3165_v9  ;;  %v4016_v27 = vld [vmem:[%s6281_s1 + $0x2ec] sm:$0xf] }
  0x91   :  { %1646 = vmatpush.bf16.msra.mxu1 %v3102_v28  ;;  %v4146_v15 = vld [vmem:[%s6281_s1 + $0x6f4] sm:$0xf0]  ;;  %v3023_v28 = vld [vmem:[%s6281_s1 + $0x2f8] sm:$0xf0]  ;;  %v3469_v8 = vld [vmem:[%s6281_s1 + $0x668] sm:$0xf] }
  0x92   :  { %1659 = vmatpush.bf16.msra.mxu2 %v3230_v29  ;;  %v3294_v29 = vor.u32 %v4086_v13, %v3293_v12  ;;  %v3534_v30 = vor.u32 %v4146_v15, %v3533_v14  ;;  %v4142_v34 = vld [vmem:[%s6281_s1 + $0x6d4] sm:$0xf0]  ;;  %v3026_v36 = vor.u32 %v4016_v27, %v3023_v28  ;;  %v2975_v4 = vld [vmem:[%s6281_s1 + $0x298] sm:$0xf0]  ;;  %v3968_v13 = vld [vmem:[%s6281_s1 + $0x16c] sm:$0xf] }
  0x93   :  { %1672 = vmatpush.bf16.msra.mxu3 %v3358_v33  ;;  %v3517_v33 = vld [vmem:[%s6281_s1 + $0x6c8] sm:$0xf]  ;;  %v4138_v49 = vld [vmem:[%s6281_s1 + $0x6b4] sm:$0xf0]  ;;  %v2978_v11 = vor.u32 %v4004_v3, %v2975_v4  ;;  %v2703_v12 = vld [vmem:[%s6281_s1 + $0x78] sm:$0xf0] }
  0x94   :  { %1634 = vmatpush.bf16.msra.mxu0 %v2958_v42  ;;  %v2879_v42 = vld [vmem:[%s6281_s1 + $0x1d8] sm:$0xf0]  ;;  %v3518_v45 = vor.u32 %v4142_v34, %v3517_v33  ;;  %v4134_v61 = vld [vmem:[%s6281_s1 + $0x694] sm:$0xf0]  ;;  %v4000_v15 = vld [vmem:[%s6281_s1 + $0x26c] sm:$0xf] }
  0x95   :  { %1647 = vmatpush.bf16.msra.mxu1 %v3086_v43  ;;  %v4012_v43 = vld [vmem:[%s6281_s1 + $0x2cc] sm:$0xf]  ;;  %v2882_v47 = vor.u32 %v3980_v39, %v2879_v42  ;;  %v4130_v9 = vld [vmem:[%s6281_s1 + $0x674] sm:$0xf0]  ;;  %v2831_v14 = vld [vmem:[%s6281_s1 + $0x178] sm:$0xf0]  ;;  %v2962_v27 = vor.u32 %v4000_v15, %v2959_v16 }
  0x96   :  { %1660 = vmatpush.bf16.msra.mxu2 %v3214_v44  ;;  %v3007_v44 = vld [vmem:[%s6281_s1 + $0x2d8] sm:$0xf0]  ;;  %v2834_v23 = vor.u32 %v3968_v13, %v2831_v14  ;;  %v3453_v24 = vld [vmem:[%s6281_s1 + $0x648] sm:$0xf]  ;;  %v4122_v39 = vld [vmem:[%s6281_s1 + $0x634] sm:$0xf0] }
  0x97   :  { %1673 = vmatpush.bf16.msra.mxu3 %v3342_v48  ;;  %v3501_v48 = vld [vmem:[%s6281_s1 + $0x6a8] sm:$0xf]  ;;  %v3010_v51 = vor.u32 %v4012_v43, %v3007_v44  ;;  %v2687_v28 = vld [vmem:[%s6281_s1 + $0x58] sm:$0xf0]  ;;  %v3928_v42 = vld [vmem:[%s6281_s1 + $0x2c] sm:$0xf] }
  0x98   :  { %1635 = vmatpush.bf16.msra.mxu0 %v2942_v54  ;;  %v2863_v54 = vld [vmem:[%s6281_s1 + $0x1b8] sm:$0xf0]  ;;  %v3502_v57 = vor.u32 %v4138_v49, %v3501_v48  ;;  %v3437_v38 = vld [vmem:[%s6281_s1 + $0x628] sm:$0xf]  ;;  %v3992_v48 = vld [vmem:[%s6281_s1 + $0x22c] sm:$0xf] }
  0x99   :  { %1648 = vmatpush.bf16.msra.mxu1 %v3070_v55  ;;  %v4008_v55 = vld [vmem:[%s6281_s1 + $0x2ac] sm:$0xf]  ;;  %v2866_v59 = vor.u32 %v3976_v53, %v2863_v54  ;;  %v2927_v49 = vld [vmem:[%s6281_s1 + $0x238] sm:$0xf0]  ;;  %v3438_v50 = vor.u32 %v4122_v39, %v3437_v38  ;;  %v4118_v52 = vld [vmem:[%s6281_s1 + $0x614] sm:$0xf0] }
  0x9a   :  { %1661 = vmatpush.bf16.msra.mxu2 %v3198_v56  ;;  %v2991_v56 = vld [vmem:[%s6281_s1 + $0x2b8] sm:$0xf0]  ;;  %v4072_v39 = vld [vmem:[%s6281_s1 + $0x4ac] sm:$0xf] }
  0x9b   :  { %1674 = vmatpush.bf16.msra.mxu3 %v3326_v60  ;;  %v3485_v60 = vld [vmem:[%s6281_s1 + $0x688] sm:$0xf]  ;;  %v2994_v63 = vor.u32 %v4008_v55, %v2991_v56  ;;  %v3924_v55 = vld [vmem:[%s6281_s1 + $0xc] sm:$0xf]  ;;  %v2655_v56 = vld [vmem:[%s6281_s1 + $0x18] sm:$0xf0] }
  0x9c   :  { %1636 = vmatpush.bf16.msra.mxu0 %v2926_v2  ;;  %v2847_v2 = vld [vmem:[%s6281_s1 + $0x198] sm:$0xf0] }
  0x9d   :  { %1649 = vmatpush.bf16.msra.mxu1 %v3054_v5  ;;  %v3486_v5 = vor.u32 %v4134_v61, %v3485_v60  ;;  %v2850_v7 = vor.u32 %v3972_v1, %v2847_v2  ;;  %v2783_v60 = vld [vmem:[%s6281_s1 + $0x118] sm:$0xf0]  ;;  %v3988_v61 = vld [vmem:[%s6281_s1 + $0x20c] sm:$0xf] }
  0x9e   :  { %1662 = vmatpush.bf16.msra.mxu2 %v3182_v6  ;;  %v2722_v6 = vor.u32 %v3940_v62, %v2719_v0  ;;  %v2911_v62 = vld [vmem:[%s6281_s1 + $0x218] sm:$0xf0]  ;;  %v4048_v0 = vld [vmem:[%s6281_s1 + $0x3ec] sm:$0xf] }
  0x9f   :  { %1675 = vmatpush.bf16.msra.mxu3 %v3310_v10  ;;  %v3936_v10 = vld [vmem:[%s6281_s1 + $0x6c] sm:$0xf]  ;;  %v3151_v1 = vld [vmem:[%s6281_s1 + $0x3f8] sm:$0xf0]  ;;  %v2914_v13 = vor.u32 %v3988_v61, %v2911_v62 }
  0xa0   :  { %1637 = vmatpush.bf16.msra.mxu0 %v2910_v17  ;;  %v3470_v17 = vor.u32 %v4130_v9, %v3469_v8  ;;  %v2706_v21 = vor.u32 %v3936_v10, %v2703_v12  ;;  %v4080_v2 = vld [vmem:[%s6281_s1 + $0x4ec] sm:$0xf]  ;;  %v3279_v4 = vld [vmem:[%s6281_s1 + $0x4f8] sm:$0xf0]  ;;  %v2658_v8 = vor.u32 %v3924_v55, %v2655_v56  ;;  %v3154_v14 = vor.u32 %v4048_v0, %v3151_v1 }
  0xa1   :  { %1650 = vmatpush.bf16.msra.mxu1 %v3038_v25  ;;  %v4126_v25 = vld [vmem:[%s6281_s1 + $0x654] sm:$0xf0]  ;;  %v4144_v10 = vld [vmem:[%s6281_s1 + $0x6ec] sm:$0xf]  ;;  %v3282_v15 = vor.u32 %v4080_v2, %v3279_v4  ;;  %v3119_v38 = vld [vmem:[%s6281_s1 + $0x3b8] sm:$0xf0] }
  0xa2   :  { %1663 = vmatpush.bf16.msra.mxu2 %v3166_v26  ;;  %v3932_v26 = vld [vmem:[%s6281_s1 + $0x4c] sm:$0xf]  ;;  %v3454_v33 = vor.u32 %v4126_v25, %v3453_v24  ;;  %v3263_v25 = vld [vmem:[%s6281_s1 + $0x4d8] sm:$0xf0] }
  0xa3   :  { %1676 = vmatpush.bf16.msra.mxu3 %v3294_v29  ;;  %1638 = vmatmul.bf16.vlgmr.msra.gmra.mxu0 %v4632_v18  ;;  %v3964_v29 = vld [vmem:[%s6281_s1 + $0x14c] sm:$0xf]  ;;  %v2690_v35 = vor.u32 %v3932_v26, %v2687_v28  ;;  %v3359_v55 = vld [vmem:[%s6281_s1 + $0x598] sm:$0xf0] }
  0xa4   :  { %1682 = vmatpush.bf16.msrb.mxu0 %v3534_v30  ;;  %1651 = vmatmul.bf16.vlgmr.msra.gmra.mxu1 %v4636_v20  ;;  %v2815_v30 = vld [vmem:[%s6281_s1 + $0x158] sm:$0xf0]  ;;  %v4108_v26 = vld [vmem:[%s6281_s1 + $0x5cc] sm:$0xf] }
  0xa5   :  { %1695 = vmatpush.bf16.msrb.mxu1 %v2770_v31  ;;  %1664 = vmatmul.bf16.vlgmr.msra.gmra.mxu2 %v4796_v40  ;;  %v3996_v31 = vld [vmem:[%s6281_s1 + $0x24c] sm:$0xf]  ;;  %v3087_v2 = vld [vmem:[%s6281_s1 + $0x378] sm:$0xf0] }
  0xa6   :  { %1708 = vmatpush.bf16.msrb.mxu2 %v2898_v32  ;;  %1677 = vmatmul.bf16.vlgmr.msra.gmra.mxu3 %v4798_v41  ;;  %v2943_v32 = vld [vmem:[%s6281_s1 + $0x258] sm:$0xf0]  ;;  %v4140_v28 = vld [vmem:[%s6281_s1 + $0x6cc] sm:$0xf] }
  0xa7   :  { %1721 = vmatpush.bf16.msrb.mxu3 %v3026_v36  ;;  %v2818_v36 = vor.u32 %v3964_v29, %v2815_v30  ;;  %v2946_v44 = vor.u32 %v3996_v31, %v2943_v32  ;;  %v3519_v29 = vld [vmem:[%s6281_s1 + $0x6d8] sm:$0xf0]  ;;  %v4132_v56 = vld [vmem:[%s6281_s1 + $0x68c] sm:$0xf] }
  0xa8   :  { %1683 = vmatpush.bf16.msrb.mxu0 %v3518_v45  ;;  %v2671_v45 = vld [vmem:[%s6281_s1 + $0x38] sm:$0xf0]  ;;  %v4032_v1 = vld [vmem:[%s6281_s1 + $0x36c] sm:$0xf] }
  0xa9   :  { %1696 = vmatpush.bf16.msrb.mxu1 %v2754_v46  ;;  %v3960_v46 = vld [vmem:[%s6281_s1 + $0x12c] sm:$0xf]  ;;  %v2674_v53 = vor.u32 %v3928_v42, %v2671_v45  ;;  %v3522_v42 = vor.u32 %v4140_v28, %v3519_v29  ;;  %v5703_v28 = vld [vmem:[%s6282_s2] sm:$0xf] }
  0xaa   :  { %1709 = vmatpush.bf16.msrb.mxu2 %v2882_v47  ;;  %v2799_v47 = vld [vmem:[%s6281_s1 + $0x138] sm:$0xf0]  ;;  %v4104_v45 = vld [vmem:[%s6281_s1 + $0x5ac] sm:$0xf] }
  0xab   :  { %1722 = vmatpush.bf16.msrb.mxu3 %v3010_v51  ;;  %v3421_v51 = vld [vmem:[%s6281_s1 + $0x608] sm:$0xf]  ;;  %v2802_v54 = vor.u32 %v3960_v46, %v2799_v47  ;;  %v3375_v46 = vld [vmem:[%s6281_s1 + $0x5b8] sm:$0xf0]  ;;  %v4136_v47 = vld [vmem:[%s6281_s1 + $0x6ac] sm:$0xf] }
  0xac   :  { %1684 = vmatpush.bf16.msrb.mxu0 %v3502_v57  ;;  %v5488_v34 = vpop.f32.mrf.mxu0  ;;  %v3956_v57 = vld [vmem:[%s6281_s1 + $0x10c] sm:$0xf]  ;;  %v3422_v3 = vor.u32 %v4118_v52, %v3421_v51  ;;  %v3378_v51 = vor.u32 %v4104_v45, %v3375_v46  ;;  %v3103_v52 = vld [vmem:[%s6281_s1 + $0x398] sm:$0xf0] }
  0xad   :  { %1697 = vmatpush.bf16.msrb.mxu1 %v2738_v58  ;;  %v5499_v43 = vpop.f32.mrf.mxu1  ;;  %v5531_v58 = vpop.f32.mrf.mxu2  ;;  %v2786_v9 = vor.u32 %v3956_v57, %v2783_v60  ;;  %v3487_v57 = vld [vmem:[%s6281_s1 + $0x698] sm:$0xf0]  ;;  %v4120_v46 = vld [vmem:[%s6281_s1 + $0x62c] sm:$0xf] }
  0xae   :  { %1710 = vmatpush.bf16.msrb.mxu2 %v2866_v59  ;;  %v2930_v59 = vor.u32 %v3992_v48, %v2927_v49  ;;  %v3503_v48 = vld [vmem:[%s6281_s1 + $0x6b8] sm:$0xf0]  ;;  %v3490_v4 = vor.u32 %v4132_v56, %v3487_v57  ;;  %v4116_v57 = vld [vmem:[%s6281_s1 + $0x60c] sm:$0xf] }
  0xaf   :  { %1723 = vmatpush.bf16.msrb.mxu3 %v2994_v63  ;;  %v5542_v63 = vpop.f32.mrf.mxu3  ;;  %v3311_v45 = vld [vmem:[%s6281_s1 + $0x538] sm:$0xf0] }
  0xb0   :  { %1685 = vmatpush.bf16.msrb.mxu0 %v3486_v5  ;;  %v4112_v5 = vld [vmem:[%s6281_s1 + $0x5ec] sm:$0xf]  ;;  %v3295_v56 = vld [vmem:[%s6281_s1 + $0x518] sm:$0xf0] }
  0xb1   :  { %1698 = vmatpush.bf16.msrb.mxu1 %v2722_v6  ;;  %v3407_v6 = vld [vmem:[%s6281_s1 + $0x5f8] sm:$0xf0] }
  0xb2   :  { %1711 = vmatpush.bf16.msrb.mxu2 %v2850_v7  ;;  %v3410_v16 = vor.u32 %v4112_v5, %v3407_v6  ;;  %v3215_v5 = vld [vmem:[%s6281_s1 + $0x478] sm:$0xf0]  ;;  %v4096_v6 = vld [vmem:[%s6281_s1 + $0x56c] sm:$0xf] }
  0xb3   :  { %1724 = vmatpush.bf16.msrb.mxu3 %v2978_v11  ;;  %v3535_v11 = vld [vmem:[%s6281_s1 + $0x6f8] sm:$0xf0] }
  0xb4   :  { %1686 = vmatpush.bf16.msrb.mxu0 %v3470_v17  ;;  %v1433_v7 = vpop.f32.mrf.mxu0  ;;  %v4044_v17 = vld [vmem:[%s6281_s1 + $0x3cc] sm:$0xf]  ;;  %v3538_v24 = vor.u32 %v4144_v10, %v3535_v11  ;;  %v3090_v10 = vor.u32 %v4032_v1, %v3087_v2 }
  0xb5   :  { %1699 = vmatpush.bf16.msrb.mxu1 %v2706_v21  ;;  %v1446_v12 = vpop.f32.mrf.mxu1  ;;  %v3135_v21 = vld [vmem:[%s6281_s1 + $0x3d8] sm:$0xf0]  ;;  %v1459_v30 = vpop.f32.mrf.mxu2 }
  0xb6   :  { %1712 = vmatpush.bf16.msrb.mxu2 %v2834_v23  ;;  %v4076_v23 = vld [vmem:[%s6281_s1 + $0x4cc] sm:$0xf]  ;;  %v3138_v31 = vor.u32 %v4044_v17, %v3135_v21  ;;  %v3343_v7 = vld [vmem:[%s6281_s1 + $0x578] sm:$0xf0] }
  0xb7   :  { %1725 = vmatpush.bf16.msrb.mxu3 %v2962_v27  ;;  %v3391_v27 = vld [vmem:[%s6281_s1 + $0x5d8] sm:$0xf0]  ;;  %v1472_v32 = vpop.f32.mrf.mxu3  ;;  %v3346_v12 = vor.u32 %v4096_v6, %v3343_v7 }
  0xb8   :  { %1687 = vmatpush.bf16.msrb.mxu0 %v3454_v33  ;;  %v3266_v33 = vor.u32 %v4076_v23, %v3263_v25  ;;  %v3199_v21 = vld [vmem:[%s6281_s1 + $0x458] sm:$0xf0]  ;;  %v4092_v23 = vld [vmem:[%s6281_s1 + $0x54c] sm:$0xf] }
  0xb9   :  { %1700 = vmatpush.bf16.msrb.mxu1 %v2690_v35  ;;  %v3394_v35 = vor.u32 %v4108_v26, %v3391_v27  ;;  %v4124_v25 = vld [vmem:[%s6281_s1 + $0x64c] sm:$0xf]  ;;  %v3455_v26 = vld [vmem:[%s6281_s1 + $0x658] sm:$0xf0] }
  0xba   :  { %1713 = vmatpush.bf16.msrb.mxu2 %v2818_v36  ;;  %v4040_v36 = vld [vmem:[%s6281_s1 + $0x3ac] sm:$0xf] }
  0xbb   :  { %1726 = vmatpush.bf16.msrb.mxu3 %v2946_v44  ;;  %v3247_v44 = vld [vmem:[%s6281_s1 + $0x4b8] sm:$0xf0]  ;;  %v3122_v49 = vor.u32 %v4040_v36, %v3119_v38  ;;  %v4056_v38 = vld [vmem:[%s6281_s1 + $0x42c] sm:$0xf] }
  0xbc   :  { %1688 = vmatpush.bf16.msrb.mxu0 %v3438_v50  ;;  %v3250_v50 = vor.u32 %v4072_v39, %v3247_v44  ;;  %v3055_v36 = vld [vmem:[%s6281_s1 + $0x338] sm:$0xf0]  ;;  %v3458_v39 = vor.u32 %v4124_v25, %v3455_v26  ;;  %v4088_v44 = vld [vmem:[%s6281_s1 + $0x52c] sm:$0xf] }
  0xbd   :  { %1701 = vmatpush.bf16.msrb.mxu1 %v2674_v53  ;;  %v3506_v53 = vor.u32 %v4136_v47, %v3503_v48  ;;  %v3439_v47 = vld [vmem:[%s6281_s1 + $0x638] sm:$0xf0]  ;;  %v269_v48 = vperm.slane %v5703_v28, 0 }
  0xbe   :  { %1714 = vmatpush.bf16.msrb.mxu2 %v2802_v54  ;;  %v4100_v54 = vld [vmem:[%s6281_s1 + $0x58c] sm:$0xf] }
  0xbf   :  { %1727 = vmatpush.bf16.msrb.mxu3 %v2930_v59  ;;  %v3362_v0 = vor.u32 %v4100_v54, %v3359_v55  ;;  %v3442_v54 = vor.u32 %v4120_v46, %v3439_v47  ;;  %v4084_v55 = vld [vmem:[%s6281_s1 + $0x50c] sm:$0xf] }
  0xc0   :  { %1689 = vmatpush.bf16.msrb.mxu0 %v3422_v3  ;;  %v5644_v60 = vpop.f32.mrf.mxu0  ;;  %v4064_v3 = vld [vmem:[%s6281_s1 + $0x46c] sm:$0xf]  ;;  %v3298_v6 = vor.u32 %v4084_v55, %v3295_v56  ;;  %v3613_v55 = vld [vmem:[%s6283_s3 + $0x90] sm:$0xf]  ;;  %v4166_v56 = vld [vmem:[%s6283_s3 + $0x94] sm:$0xf0] }
  0xc1   :  { %1702 = vmatpush.bf16.msrb.mxu1 %v2658_v8  ;;  %v5646_v61 = vpop.f32.mrf.mxu1  ;;  %v4128_v8 = vld [vmem:[%s6281_s1 + $0x66c] sm:$0xf]  ;;  %v3218_v11 = vor.u32 %v4064_v3, %v3215_v5  ;;  %v3661_v3 = vld [vmem:[%s6283_s3 + $0xf0] sm:$0xf] }
  0xc2   :  { %1715 = vmatpush.bf16.msrb.mxu2 %v2786_v9  ;;  %v3471_v9 = vld [vmem:[%s6281_s1 + $0x678] sm:$0xf0] }
  0xc3   :  { %1728 = vmatpush.bf16.msrb.mxu3 %v2914_v13  ;;  %1690 = vmatmul.bf16.vlgmr.msrb.gmra.mxu0 %v4788_v37  ;;  %v4028_v13 = vld [vmem:[%s6281_s1 + $0x34c] sm:$0xf]  ;;  %v3474_v17 = vor.u32 %v4128_v8, %v3471_v9  ;;  %v1432_v9 = vadd.f32 %v5488_v34, %v269_v48 }
  0xc4   :  { %1734 = vmatpush.bf16.msra.mxu0 %v3154_v14  ;;  %1703 = vmatmul.bf16.vlgmr.msrb.gmra.mxu1 %v4634_v19  ;;  %v3231_v19 = vld [vmem:[%s6281_s1 + $0x498] sm:$0xf0] }
  0xc5   :  { %1747 = vmatpush.bf16.msra.mxu1 %v3282_v15  ;;  %1716 = vmatmul.bf16.vlgmr.msrb.gmra.mxu2 %v4638_v22  ;;  %v4036_v22 = vld [vmem:[%s6281_s1 + $0x38c] sm:$0xf]  ;;  %v3071_v14 = vld [vmem:[%s6281_s1 + $0x358] sm:$0xf0] }
  0xc6   :  { %1760 = vmatpush.bf16.msra.mxu2 %v3410_v16  ;;  %1729 = vmatmul.bf16.vlgmr.msrb.gmra.mxu3 %v4632_v18  ;;  %v4068_v18 = vld [vmem:[%s6281_s1 + $0x48c] sm:$0xf]  ;;  %v3106_v59 = vor.u32 %v4036_v22, %v3103_v52  ;;  %v3074_v29 = vor.u32 %v4028_v13, %v3071_v14  ;;  %v3314_v22 = vor.u32 %v4088_v44, %v3311_v45  ;;  %v3039_v52 = vld [vmem:[%s6281_s1 + $0x318] sm:$0xf0]  ;;  %v3653_v13 = vld [vmem:[%s6283_s3 + $0xe0] sm:$0xf] }
  0xc7   :  { %1773 = vmatpush.bf16.msra.mxu3 %v3538_v24  ;;  %v3234_v62 = vor.u32 %v4068_v18, %v3231_v19  ;;  %v4060_v15 = vld [vmem:[%s6281_s1 + $0x44c] sm:$0xf]  ;;  %v3327_v24 = vld [vmem:[%s6281_s1 + $0x558] sm:$0xf0]  ;;  %v4176_v14 = vld [vmem:[%s6283_s3 + $0xe4] sm:$0xf0] }
  0xc8   :  { %1735 = vmatpush.bf16.msra.mxu0 %v3138_v31  ;;  %v5681_v16 = vpop.f32.mrf.mxu2  ;;  %v1485_v30 = vpop.f32.mrf.mxu0  ;;  %v3202_v32 = vor.u32 %v4060_v15, %v3199_v21  ;;  %v4052_v18 = vld [vmem:[%s6281_s1 + $0x40c] sm:$0xf]  ;;  %v1445_v15 = vadd.f32 %v5499_v43, %v1432_v9  ;;  %v4158_v21 = vld [vmem:[%s6283_s3 + $0x54] sm:$0xf0]  ;;  %v3645_v43 = vld [vmem:[%s6283_s3 + $0xd0] sm:$0xf] }
  0xc9   :  { %1748 = vmatpush.bf16.msra.mxu1 %v3266_v33  ;;  %v5698_v27 = vpop.f32.mrf.mxu3  ;;  %v1498_v31 = vpop.f32.mrf.mxu1  ;;  %v3330_v33 = vor.u32 %v4092_v23, %v3327_v24  ;;  %v3654_v23 = vor.u32 %v4176_v14, %v3653_v13  ;;  %v3557_v44 = vld [vmem:[%s6283_s3 + $0x20] sm:$0xf]  ;;  %v4152_v45 = vld [vmem:[%s6283_s3 + $0x24] sm:$0xf0]  ;;  %v4159_v13 = vld [vmem:[%s6283_s3 + $0x64] sm:$0xf] }
  0xca   :  { %1761 = vmatpush.bf16.msra.mxu2 %v3394_v35  ;;  %v4024_v35 = vld [vmem:[%s6281_s1 + $0x32c] sm:$0xf]  ;;  %v1458_v25 = vadd.f32 %v5531_v58, %v1445_v15  ;;  %v4175_v15 = vld [vmem:[%s6283_s3 + $0xe4] sm:$0xf] }
  0xcb   :  { %1774 = vmatpush.bf16.msra.mxu3 %v3522_v42  ;;  %v3183_v42 = vld [vmem:[%s6281_s1 + $0x438] sm:$0xf0]  ;;  %v3591_v14 = vld [vmem:[%s6283_s3 + $0x68] sm:$0xf0] }
  0xcc   :  { %1736 = vmatpush.bf16.msra.mxu0 %v3122_v49  ;;  %v3058_v49 = vor.u32 %v4024_v35, %v3055_v36  ;;  %v1471_v31 = vadd.f32 %v5542_v63, %v1458_v25  ;;  %v3594_v25 = vor.u32 %v4159_v13, %v3591_v14 }
  0xcd   :  { %1749 = vmatpush.bf16.msra.mxu1 %v3250_v50  ;;  %v4020_v50 = vld [vmem:[%s6281_s1 + $0x30c] sm:$0xf] }
  0xce   :  { %1762 = vmatpush.bf16.msra.mxu2 %v3378_v51  ;;  %v3186_v51 = vor.u32 %v4056_v38, %v3183_v42  ;;  %v3042_v2 = vor.u32 %v4020_v50, %v3039_v52  ;;  %v3629_v38 = vld [vmem:[%s6283_s3 + $0xb0] sm:$0xf]  ;;  %v1484_v42 = vadd.f32 %v5644_v60, %v1471_v31  ;;  %v4168_v60 = vld [vmem:[%s6283_s3 + $0xa4] sm:$0xf0]  ;;  %v270_v50 = vperm.slane %v5703_v28, 1 }
  0xcf   :  { %1775 = vmatpush.bf16.msra.mxu3 %v3506_v53  ;;  %v3167_v53 = vld [vmem:[%s6281_s1 + $0x418] sm:$0xf0] }
  0xd0   :  { %1737 = vmatpush.bf16.msra.mxu0 %v3106_v59  ;;  %v1511_v19 = vpop.f32.mrf.mxu2  ;;  %v3423_v59 = vld [vmem:[%s6281_s1 + $0x618] sm:$0xf0]  ;;  %v3170_v5 = vor.u32 %v4052_v18, %v3167_v53  ;;  %v1497_v52 = vadd.f32 %v5646_v61, %v1484_v42  ;;  %v3549_v18 = vld [vmem:[%s6283_s3 + $0x10] sm:$0xf]  ;;  %v4150_v53 = vld [vmem:[%s6283_s3 + $0x14] sm:$0xf0]  ;;  %v1523_v61 = vadd.f32 %v5698_v27, %v270_v50 }
  0xd1   :  { %1750 = vmatpush.bf16.msra.mxu1 %v3234_v62  ;;  %v3597_v62 = vld [vmem:[%s6283_s3 + $0x70] sm:$0xf]  ;;  %v1524_v1 = vpop.f32.mrf.mxu3  ;;  %v3426_v7 = vor.u32 %v4116_v57, %v3423_v59  ;;  %v3550_v57 = vor.u32 %v4150_v53, %v3549_v18  ;;  %v3599_v27 = vld [vmem:[%s6283_s3 + $0x78] sm:$0xf0]  ;;  %v4171_v42 = vld [vmem:[%s6283_s3 + $0xc4] sm:$0xf] }
  0xd2   :  { %1763 = vmatpush.bf16.msra.mxu2 %v3362_v0  ;;  %v4162_v0 = vld [vmem:[%s6283_s3 + $0x74] sm:$0xf0]  ;;  %v1510_v59 = vadd.f32 %v5681_v16, %v1497_v52  ;;  %v3614_v1 = vor.u32 %v4166_v56, %v3613_v55  ;;  %v3605_v16 = vld [vmem:[%s6283_s3 + $0x80] sm:$0xf]  ;;  %v3647_v31 = vld [vmem:[%s6283_s3 + $0xd8] sm:$0xf0] }
  0xd3   :  { %1776 = vmatpush.bf16.msra.mxu3 %v3490_v4  ;;  %v4178_v4 = vld [vmem:[%s6283_s3 + $0xf4] sm:$0xf0]  ;;  %v3598_v8 = vor.u32 %v4162_v0, %v3597_v62  ;;  %v3541_v62 = vld [vmem:[%s6283_s3] sm:$0xf]  ;;  %v4148_v0 = vld [vmem:[%s6283_s3 + $0x4] sm:$0xf0] }
  0xd4   :  { %1738 = vmatpush.bf16.msra.mxu0 %v3090_v10  ;;  %v3589_v10 = vld [vmem:[%s6283_s3 + $0x60] sm:$0xf]  ;;  %v3542_v9 = vor.u32 %v4148_v0, %v3541_v62  ;;  %v4153_v52 = vld [vmem:[%s6283_s3 + $0x34] sm:$0xf]  ;;  %v3567_v18 = vld [vmem:[%s6283_s3 + $0x38] sm:$0xf0] }
  0xd5   :  { %1751 = vmatpush.bf16.msra.mxu1 %v3218_v11  ;;  %v4160_v11 = vld [vmem:[%s6283_s3 + $0x64] sm:$0xf0]  ;;  %v4169_v56 = vld [vmem:[%s6283_s3 + $0xb4] sm:$0xf]  ;;  %v4151_v62 = vld [vmem:[%s6283_s3 + $0x24] sm:$0xf] }
  0xd6   :  { %1764 = vmatpush.bf16.msra.mxu2 %v3346_v12  ;;  %v3662_v12 = vor.u32 %v4178_v4, %v3661_v3  ;;  %v3590_v34 = vor.u32 %v4160_v11, %v3589_v10  ;;  %v4164_v4 = vld [vmem:[%s6283_s3 + $0x84] sm:$0xf0]  ;;  %v1786_v10 = vmax.f32 %v1510_v59, 0.0  ;;  %v3559_v0 = vld [vmem:[%s6283_s3 + $0x28] sm:$0xf0] }
  0xd7   :  { %1777 = vmatpush.bf16.msra.mxu3 %v3474_v17  ;;  %v3581_v17 = vld [vmem:[%s6283_s3 + $0x50] sm:$0xf] }
  0xd8   :  { %1739 = vmatpush.bf16.msra.mxu0 %v3074_v29  ;;  %v3582_v24 = vor.u32 %v4158_v21, %v3581_v17  ;;  %v3637_v29 = vld [vmem:[%s6283_s3 + $0xc0] sm:$0xf]  ;;  %v3655_v17 = vld [vmem:[%s6283_s3 + $0xe8] sm:$0xf0]  ;;  %v3725_v21 = vld [vmem:[%s6283_s3 + $0x170] sm:$0xf] }
  0xd9   :  { %1752 = vmatpush.bf16.msra.mxu1 %v3202_v32  ;;  %v3565_v32 = vld [vmem:[%s6283_s3 + $0x30] sm:$0xf] }
  0xda   :  { %1765 = vmatpush.bf16.msra.mxu2 %v3330_v33  ;;  %v4154_v33 = vld [vmem:[%s6283_s3 + $0x34] sm:$0xf0] }
  0xdb   :  { %1778 = vmatpush.bf16.msra.mxu3 %v3458_v39  ;;  %v4170_v39 = vld [vmem:[%s6283_s3 + $0xb4] sm:$0xf0]  ;;  %v3566_v63 = vor.u32 %v4154_v33, %v3565_v32  ;;  %v3709_v32 = vld [vmem:[%s6283_s3 + $0x150] sm:$0xf] }
  0xdc   :  { %1740 = vmatpush.bf16.msra.mxu0 %v3058_v49  ;;  %v3630_v46 = vor.u32 %v4170_v39, %v3629_v38  ;;  %v3621_v49 = vld [vmem:[%s6283_s3 + $0xa0] sm:$0xf]  ;;  %v4190_v33 = vld [vmem:[%s6283_s3 + $0x154] sm:$0xf0]  ;;  %v4155_v38 = vld [vmem:[%s6283_s3 + $0x44] sm:$0xf] }
  0xdd   :  { %1753 = vmatpush.bf16.msra.mxu1 %v3186_v51  ;;  %v3558_v51 = vor.u32 %v4152_v45, %v3557_v44  ;;  %v3622_v19 = vor.u32 %v4168_v60, %v3621_v49  ;;  %v3575_v39 = vld [vmem:[%s6283_s3 + $0x48] sm:$0xf0]  ;;  %v3710_v44 = vor.u32 %v4190_v33, %v3709_v32 }
  0xde   :  { %1766 = vmatpush.bf16.msra.mxu2 %v3314_v22  ;;  %v3639_v45 = vld [vmem:[%s6283_s3 + $0xc8] sm:$0xf0]  ;;  %v3578_v50 = vor.u32 %v4155_v38, %v3575_v39  ;;  %v4191_v39 = vld [vmem:[%s6283_s3 + $0x164] sm:$0xf] }
  0xdf   :  { %1779 = vmatpush.bf16.msra.mxu3 %v3442_v54  ;;  %v3642_v53 = vor.u32 %v4171_v42, %v3639_v45  ;;  %v4210_v45 = vld [vmem:[%s6283_s3 + $0x1f4] sm:$0xf0] }
  0xe0   :  { %1741 = vmatpush.bf16.msra.mxu0 %v3042_v2  ;;  %v1535_v30 = vpop.f32.mrf.mxu0  ;;  %v4161_v2 = vld [vmem:[%s6283_s3 + $0x74] sm:$0xf] }
  0xe1   :  { %1754 = vmatpush.bf16.msra.mxu1 %v3170_v5  ;;  %v1548_v36 = vpop.f32.mrf.mxu1  ;;  %v3602_v11 = vor.u32 %v4161_v2, %v3599_v27  ;;  %v4184_v27 = vld [vmem:[%s6283_s3 + $0x124] sm:$0xf0] }
  0xe2   :  { %1767 = vmatpush.bf16.msra.mxu2 %v3298_v6  ;;  %v4177_v6 = vld [vmem:[%s6283_s3 + $0xf4] sm:$0xf] }
  0xe3   :  { %1780 = vmatpush.bf16.msra.mxu3 %v3426_v7  ;;  %1742 = vmatmul.bf16.vlgmr.msra.gmra.mxu0 %v4636_v20  ;;  %v4174_v20 = vld [vmem:[%s6283_s3 + $0xd4] sm:$0xf0]  ;;  %v3663_v7 = vld [vmem:[%s6283_s3 + $0xf8] sm:$0xf0] }
  0xe4   :  { %2184 = vmatpush.bf16.msrb.mxu0 %v3598_v8  ;;  %1755 = vmatmul.bf16.vlgmr.msra.gmra.mxu1 %v4796_v40  ;;  %v3573_v40 = vld [vmem:[%s6283_s3 + $0x40] sm:$0xf]  ;;  %v3646_v26 = vor.u32 %v4174_v20, %v3645_v43  ;;  %v1536_v8 = vadd.f32 %v1535_v30, %v1523_v61  ;;  %v3631_v61 = vld [vmem:[%s6283_s3 + $0xb8] sm:$0xf0] }
  0xe5   :  { %2197 = vmatpush.bf16.msrb.mxu1 %v3662_v12  ;;  %1768 = vmatmul.bf16.vlgmr.msra.gmra.mxu2 %v4798_v41  ;;  %v4156_v41 = vld [vmem:[%s6283_s3 + $0x44] sm:$0xf0]  ;;  %v3606_v12 = vor.u32 %v4164_v4, %v3605_v16  ;;  %v3634_v2 = vor.u32 %v4169_v56, %v3631_v61  ;;  %v4167_v4 = vld [vmem:[%s6283_s3 + $0xa4] sm:$0xf]  ;;  %v4185_v56 = vld [vmem:[%s6283_s3 + $0x134] sm:$0xf] }
  0xe6   :  { %1781 = vmatmul.bf16.vlgmr.msra.gmra.mxu3 %v4788_v37  ;;  %v4172_v37 = vld [vmem:[%s6283_s3 + $0xc4] sm:$0xf0]  ;;  %v3574_v58 = vor.u32 %v4156_v41, %v3573_v40  ;;  %v1549_v43 = vadd.f32 %v1548_v36, %v1536_v8  ;;  %v3717_v40 = vld [vmem:[%s6283_s3 + $0x160] sm:$0xf] }
  0xe7   :  { %v3638_v35 = vor.u32 %v4172_v37, %v3637_v29  ;;  %v4192_v41 = vld [vmem:[%s6283_s3 + $0x164] sm:$0xf0]  ;;  %v3583_v29 = vld [vmem:[%s6283_s3 + $0x58] sm:$0xf0]  ;;  %v3658_v37 = vor.u32 %v4175_v15, %v3655_v17  ;;  %v4182_v15 = vld [vmem:[%s6283_s3 + $0x114] sm:$0xf0] }
  0xe8   :  { %2185 = vmatpush.bf16.msrb.mxu0 %v3590_v34  ;;  %v5829_v47 = vpop.f32.mrf.mxu2  ;;  %v1537_v22 = vpop.f32.mrf.mxu0  ;;  %v3666_v34 = vor.u32 %v4177_v6, %v3663_v7  ;;  %v3718_v30 = vor.u32 %v4192_v41, %v3717_v40  ;;  %v3562_v7 = vor.u32 %v4151_v62, %v3559_v0  ;;  %v4165_v17 = vld [vmem:[%s6283_s3 + $0x94] sm:$0xf]  ;;  %v4163_v41 = vld [vmem:[%s6283_s3 + $0x84] sm:$0xf]  ;;  %v3765_v62 = vld [vmem:[%s6283_s3 + $0x1c0] sm:$0xf] }
  0xe9   :  { %2198 = vmatpush.bf16.msrb.mxu1 %v3654_v23  ;;  %v5831_v48 = vpop.f32.mrf.mxu3  ;;  %v1550_v54 = vpop.f32.mrf.mxu1  ;;  %v4194_v23 = vld [vmem:[%s6283_s3 + $0x174] sm:$0xf0] }
  0xea   :  { %v3726_v20 = vor.u32 %v4194_v23, %v3725_v21  ;;  %v4186_v54 = vld [vmem:[%s6283_s3 + $0x134] sm:$0xf0]  ;;  %v3615_v21 = vld [vmem:[%s6283_s3 + $0x98] sm:$0xf0] }
  0xeb   :  { %v3618_v40 = vor.u32 %v4165_v17, %v3615_v21  ;;  %v4200_v17 = vld [vmem:[%s6283_s3 + $0x1a4] sm:$0xf0] }
  0xec   :  { %2186 = vmatpush.bf16.msrb.mxu0 %v3582_v24  ;;  %v5897_v24 = vpack.c.bf16 %v1786_v10, %v1786_v10  ;;  %2210 = vmatpush.bf16.msrb.mxu2 %v3726_v20  ;;  %v4149_v10 = vld [vmem:[%s6283_s3 + $0x14] sm:$0xf]  ;;  %v3543_v20 = vld [vmem:[%s6283_s3 + $0x8] sm:$0xf0] }
  0xed   :  { %2199 = vmatpush.bf16.msrb.mxu1 %v3646_v26  ;;  %v4157_v26 = vld [vmem:[%s6283_s3 + $0x54] sm:$0xf] }
  0xee   :  { %v3586_v36 = vor.u32 %v4157_v26, %v3583_v29  ;;  %v3669_v26 = vld [vmem:[%s6283_s3 + $0x100] sm:$0xf]  ;;  %v4180_v29 = vld [vmem:[%s6283_s3 + $0x104] sm:$0xf0] }
  0xf0   :  { %2187 = vmatpush.bf16.msrb.mxu0 %v3574_v58  ;;  %v1563_v3 = vpop.f32.mrf.mxu2  ;;  %v4173_v58 = vld [vmem:[%s6283_s3 + $0xd4] sm:$0xf]  ;;  %2211 = vmatpush.bf16.msrb.mxu2 %v3718_v30 }
  0xf1   :  { %2200 = vmatpush.bf16.msrb.mxu1 %v3638_v35  ;;  %v1576_v5 = vpop.f32.mrf.mxu3  ;;  %v1562_v35 = vadd.f32 %v5829_v47, %v1549_v43  ;;  %v4188_v47 = vld [vmem:[%s6283_s3 + $0x144] sm:$0xf0]  ;;  %v3685_v3 = vld [vmem:[%s6283_s3 + $0x120] sm:$0xf]  ;;  %v4147_v43 = vld [vmem:[%s6283_s3 + $0x4] sm:$0xf] }
  0xf2   :  { %v3623_v5 = vld [vmem:[%s6283_s3 + $0xa8] sm:$0xf0]  ;;  %v3686_v13 = vor.u32 %v4184_v27, %v3685_v3  ;;  %v4193_v30 = vld [vmem:[%s6283_s3 + $0x174] sm:$0xf]  ;;  %v3546_v32 = vor.u32 %v4147_v43, %v3543_v20  ;;  %v4183_v3 = vld [vmem:[%s6283_s3 + $0x124] sm:$0xf] }
  0xf3   :  { %v1575_v49 = vadd.f32 %v5831_v48, %v1562_v35  ;;  %v3693_v48 = vld [vmem:[%s6283_s3 + $0x130] sm:$0xf]  ;;  %v3626_v14 = vor.u32 %v4167_v4, %v3623_v5  ;;  %v3670_v35 = vor.u32 %v4180_v29, %v3669_v26  ;;  %v3687_v27 = vld [vmem:[%s6283_s3 + $0x128] sm:$0xf0]  ;;  %v4198_v29 = vld [vmem:[%s6283_s3 + $0x194] sm:$0xf0] }
  0xf4   :  { %2188 = vmatpush.bf16.msrb.mxu0 %v3566_v63  ;;  %v3650_v63 = vor.u32 %v4173_v58, %v3647_v31  ;;  %2212 = vmatpush.bf16.msrb.mxu2 %v3710_v44  ;;  %v3727_v31 = vld [vmem:[%s6283_s3 + $0x178] sm:$0xf0]  ;;  %v3789_v44 = vld [vmem:[%s6283_s3 + $0x1f0] sm:$0xf]  ;;  %v3671_v43 = vld [vmem:[%s6283_s3 + $0x108] sm:$0xf0] }
  0xf5   :  { %2201 = vmatpush.bf16.msrb.mxu1 %v3630_v46  ;;  %v3701_v46 = vld [vmem:[%s6283_s3 + $0x140] sm:$0xf]  ;;  %v3730_v38 = vor.u32 %v4193_v30, %v3727_v31  ;;  %v3741_v26 = vld [vmem:[%s6283_s3 + $0x190] sm:$0xf]  ;;  %v4196_v30 = vld [vmem:[%s6283_s3 + $0x184] sm:$0xf0] }
  0xf8   :  { %2189 = vmatpush.bf16.msrb.mxu0 %v3558_v51 }
  0xf9   :  { %2202 = vmatpush.bf16.msrb.mxu1 %v3622_v19  ;;  %v3702_v19 = vor.u32 %v4188_v47, %v3701_v46  ;;  %v4189_v46 = vld [vmem:[%s6283_s3 + $0x154] sm:$0xf]  ;;  %v3790_v47 = vor.u32 %v4210_v45, %v3789_v44 }
  0xfb   :  { %2213 = vmatpush.bf16.msrb.mxu2 %v3702_v19  ;;  %2223 = vmatpush.bf16.msrb.mxu3 %v3790_v47 }
  0xfc   :  { %2190 = vmatpush.bf16.msrb.mxu0 %v3550_v57  ;;  %v3570_v57 = vor.u32 %v4153_v52, %v3567_v18 }
  0xfd   :  { %2203 = vmatpush.bf16.msrb.mxu1 %v3614_v1  ;;  %v3694_v1 = vor.u32 %v4186_v54, %v3693_v48  ;;  %v271_v48 = vperm.slane %v5703_v28, 2  ;;  %v3773_v54 = vld [vmem:[%s6283_s3 + $0x1d0] sm:$0xf] }
  0xff   :  { %2214 = vmatpush.bf16.msrb.mxu2 %v3694_v1 }
 0x100   :  { %2191 = vmatpush.bf16.msrb.mxu0 %v3542_v9  ;;  %v1587_v60 = vpop.f32.mrf.mxu0 }
 0x101   :  { %2204 = vmatpush.bf16.msrb.mxu1 %v3606_v12  ;;  %v1588_v51 = vadd.f32 %v1587_v60, %v1575_v49  ;;  %v1600_v22 = vpop.f32.mrf.mxu1  ;;  %v3711_v49 = vld [vmem:[%s6283_s3 + $0x158] sm:$0xf0] }
 0x103   :  { %2192 = vmatmul.bf16.vlgmr.msrb.gmra.mxu0 %v5897_v24  ;;  %v1601_v55 = vadd.f32 %v1600_v22, %v1588_v51  ;;  %2215 = vmatpush.bf16.msrb.mxu2 %v3686_v13  ;;  %v4208_v51 = vld [vmem:[%s6283_s3 + $0x1e4] sm:$0xf0]  ;;  %v4187_v22 = vld [vmem:[%s6283_s3 + $0x144] sm:$0xf] }
 0x104   :  { %2236 = vmatpush.bf16.msra.mxu0 %v3602_v11  ;;  %v3551_v11 = vld [vmem:[%s6283_s3 + $0x18] sm:$0xf0] }
 0x105   :  { %2249 = vmatpush.bf16.msra.mxu1 %v3666_v34  ;;  %v1787_v59 = vmax.f32 %v1601_v55, 0.0  ;;  %v3677_v34 = vld [vmem:[%s6283_s3 + $0x110] sm:$0xf]  ;;  %v3554_v23 = vor.u32 %v4149_v10, %v3551_v11  ;;  %v4206_v55 = vld [vmem:[%s6283_s3 + $0x1d4] sm:$0xf0] }
 0x106   :  { %v4202_v10 = vld [vmem:[%s6283_s3 + $0x1b4] sm:$0xf0] }
 0x107   :  { %v1791_v16 = vpack.c.bf16 %v1787_v59, %v1787_v59  ;;  %v3695_v59 = vld [vmem:[%s6283_s3 + $0x138] sm:$0xf0] }
 0x108   :  { %2237 = vmatpush.bf16.msra.mxu0 %v3594_v25  ;;  %v5980_v6 = vpop.f32.mrf.mxu2  ;;  %v1589_v9 = vpop.f32.mrf.mxu0  ;;  %v3678_v25 = vor.u32 %v4182_v15, %v3677_v34  ;;  %v3698_v1 = vor.u32 %v4185_v56, %v3695_v59  ;;  %v3749_v15 = vld [vmem:[%s6283_s3 + $0x1a0] sm:$0xf] }
 0x109   :  { %2250 = vmatpush.bf16.msra.mxu1 %v3658_v37  ;;  %v5982_v8 = vpop.f32.mrf.mxu3  ;;  %v1602_v12 = vpop.f32.mrf.mxu1  ;;  %v3607_v37 = vld [vmem:[%s6283_s3 + $0x88] sm:$0xf0]  ;;  %v1614_v4 = vadd.f32 %v5980_v6, %v271_v48  ;;  %v3757_v9 = vld [vmem:[%s6283_s3 + $0x1b0] sm:$0xf]  ;;  %v3679_v6 = vld [vmem:[%s6283_s3 + $0x118] sm:$0xf0]  ;;  %v3750_v20 = vor.u32 %v4200_v17, %v3749_v15 }
 0x10a   :  { %2205 = vmatmul.bf16.vlgmr.msrb.gmra.mxu1 %v1791_v16  ;;  %2216 = vmatpush.bf16.msrb.mxu2 %v3678_v25  ;;  %v4181_v12 = vld [vmem:[%s6283_s3 + $0x114] sm:$0xf]  ;;  %v3758_v13 = vor.u32 %v4202_v10, %v3757_v9 }
 0x10b   :  { %v3682_v34 = vor.u32 %v4181_v12, %v3679_v6 }
 0x10c   :  { %2238 = vmatpush.bf16.msra.mxu0 %v3586_v36  ;;  %v3610_v36 = vor.u32 %v4163_v41, %v3607_v37  ;;  %v3733_v37 = vld [vmem:[%s6283_s3 + $0x180] sm:$0xf] }
 0x10d   :  { %2251 = vmatpush.bf16.msra.mxu1 %v3650_v63  ;;  %v3719_v63 = vld [vmem:[%s6283_s3 + $0x168] sm:$0xf0]  ;;  %v3734_v31 = vor.u32 %v4196_v30, %v3733_v37 }
 0x10e   :  { %2217 = vmatpush.bf16.msrb.mxu2 %v3670_v35  ;;  %v3722_v42 = vor.u32 %v4191_v39, %v3719_v63  ;;  %v3791_v35 = vld [vmem:[%s6283_s3 + $0x1f8] sm:$0xf0]  ;;  %v4207_v63 = vld [vmem:[%s6283_s3 + $0x1e4] sm:$0xf] }
 0x110   :  { %2239 = vmatpush.bf16.msra.mxu0 %v3578_v50  ;;  %v1615_v58 = vpop.f32.mrf.mxu2  ;;  %v3781_v50 = vld [vmem:[%s6283_s3 + $0x1e0] sm:$0xf] }
 0x111   :  { %2252 = vmatpush.bf16.msra.mxu1 %v3642_v53  ;;  %v1628_v33 = vpop.f32.mrf.mxu3  ;;  %v3782_v18 = vor.u32 %v4208_v51, %v3781_v50  ;;  %v3703_v53 = vld [vmem:[%s6283_s3 + $0x148] sm:$0xf0]  ;;  %v3742_v58 = vor.u32 %v4198_v29, %v3741_v26 }
 0x112   :  { %2262 = vmatpush.bf16.msra.mxu2 %v3730_v38  ;;  %v3706_v19 = vor.u32 %v4187_v22, %v3703_v53  ;;  %v4209_v33 = vld [vmem:[%s6283_s3 + $0x1f4] sm:$0xf]  ;;  %v3767_v53 = vld [vmem:[%s6283_s3 + $0x1c8] sm:$0xf0] }
 0x113   :  { %2224 = vmatpush.bf16.msrb.mxu3 %v3782_v18  ;;  %v4203_v18 = vld [vmem:[%s6283_s3 + $0x1c4] sm:$0xf] }
 0x114   :  { %2240 = vmatpush.bf16.msra.mxu0 %v3570_v57  ;;  %v3774_v57 = vor.u32 %v4206_v55, %v3773_v54  ;;  %v4201_v54 = vld [vmem:[%s6283_s3 + $0x1b4] sm:$0xf]  ;;  %v3759_v55 = vld [vmem:[%s6283_s3 + $0x1b8] sm:$0xf0] }
 0x115   :  { %2253 = vmatpush.bf16.msra.mxu1 %v3634_v2  ;;  %v4204_v2 = vld [vmem:[%s6283_s3 + $0x1c4] sm:$0xf0]  ;;  %v3762_v56 = vor.u32 %v4201_v54, %v3759_v55 }
 0x116   :  { %2263 = vmatpush.bf16.msra.mxu2 %v3722_v42  ;;  %v3783_v42 = vld [vmem:[%s6283_s3 + $0x1e8] sm:$0xf0] }
 0x117   :  { %2225 = vmatpush.bf16.msrb.mxu3 %v3774_v57  ;;  %v3786_v45 = vor.u32 %v4207_v63, %v3783_v42  ;;  %v3751_v57 = vld [vmem:[%s6283_s3 + $0x1a8] sm:$0xf0]  ;;  %v4218_v63 = vld [vmem:[%s6285_s5 + $0x38] sm:$0xff]  ;;  %v4217_v42 = vld [vmem:[%s6285_s5 + $0x30] sm:$0xff] }
 0x118   :  { %2241 = vmatpush.bf16.msra.mxu0 %v3562_v7  ;;  %v3690_v7 = vor.u32 %v4183_v3, %v3687_v27  ;;  %v272_v3 = vperm.slane %v5703_v28, 3  ;;  %v4220_v54 = vld [vmem:[%s6285_s5 + $0x48] sm:$0xff] }
 0x119   :  { %2254 = vmatpush.bf16.msra.mxu1 %v3626_v14  ;;  %v1627_v14 = vadd.f32 %v5982_v8, %v1614_v4  ;;  %v3735_v4 = vld [vmem:[%s6283_s3 + $0x188] sm:$0xf0] }
 0x11c   :  { %2242 = vmatpush.bf16.msra.mxu0 %v3554_v23  ;;  %v4179_v23 = vld [vmem:[%s6283_s3 + $0x104] sm:$0xf] }
 0x11d   :  { %2255 = vmatpush.bf16.msra.mxu1 %v3618_v40  ;;  %v3674_v40 = vor.u32 %v4179_v23, %v3671_v43 }
 0x120   :  { %2243 = vmatpush.bf16.msra.mxu0 %v3546_v32  ;;  %v1639_v60 = vpop.f32.mrf.mxu0 }
 0x121   :  { %2256 = vmatpush.bf16.msra.mxu1 %v3610_v36  ;;  %v1652_v52 = vpop.f32.mrf.mxu1  ;;  %v1640_v25 = vadd.f32 %v1639_v60, %v1627_v14  ;;  %v3794_v36 = vor.u32 %v4209_v33, %v3791_v35 }
 0x123   :  { %2244 = vmatmul.bf16.vlgmr.msra.gmra.mxu0 %v5897_v24  ;;  %v3714_v24 = vor.u32 %v4189_v46, %v3711_v49  ;;  %v1653_v41 = vadd.f32 %v1652_v52, %v1640_v25  ;;  %v4205_v49 = vld [vmem:[%s6283_s3 + $0x1d4] sm:$0xf] }
 0x124   :  { %2257 = vmatmul.bf16.vlgmr.msra.gmra.mxu1 %v1791_v16  ;;  %v3766_v16 = vor.u32 %v4204_v2, %v3765_v62  ;;  %v3743_v2 = vld [vmem:[%s6283_s3 + $0x198] sm:$0xf0]  ;;  %2424 = vmatpush.bf16.msrb.mxu0 %v4218_v63 }
 0x125   :  { %2264 = vmatpush.bf16.msra.mxu2 %v3714_v24  ;;  %v3775_v24 = vld [vmem:[%s6283_s3 + $0x1d8] sm:$0xf0] }
 0x126   :  { %2226 = vmatpush.bf16.msrb.mxu3 %v3766_v16  ;;  %v3778_v50 = vor.u32 %v4205_v49, %v3775_v24  ;;  %v4195_v16 = vld [vmem:[%s6283_s3 + $0x184] sm:$0xf]  ;;  %v4214_v49 = vld [vmem:[%s6285_s5 + $0x18] sm:$0xff]  ;;  %v4213_v24 = vld [vmem:[%s6285_s5 + $0x10] sm:$0xff] }
 0x128   :  { %v1665_v61 = vpop.f32.mrf.mxu2  ;;  %v1641_v5 = vpop.f32.mrf.mxu0  ;;  %2425 = vmatpush.bf16.msrb.mxu0 %v4217_v42 }
 0x129   :  { %2265 = vmatpush.bf16.msra.mxu2 %v3706_v19  ;;  %v1678_v0 = vpop.f32.mrf.mxu3  ;;  %v1654_v11 = vpop.f32.mrf.mxu1  ;;  %v1666_v32 = vadd.f32 %v1665_v61, %v1653_v41  ;;  %v3770_v19 = vor.u32 %v4203_v18, %v3767_v53  ;;  %v4199_v61 = vld [vmem:[%s6283_s3 + $0x1a4] sm:$0xf]  ;;  %v4222_v53 = vld [vmem:[%s6285_s5 + $0x58] sm:$0xff] }
 0x12a   :  { %2227 = vmatpush.bf16.msrb.mxu3 %v3758_v13  ;;  %v4223_v18 = vld [vmem:[%s6285_s5 + $0x60] sm:$0xff] }
 0x12b   :  { %v1679_v38 = vadd.f32 %v1678_v0, %v1666_v32  ;;  %v3754_v0 = vor.u32 %v4199_v61, %v3751_v57  ;;  %v4234_v61 = vld [vmem:[%s6287_s7 + $0x38] sm:$0xff]  ;;  %v4233_v57 = vld [vmem:[%s6287_s7 + $0x30] sm:$0xff] }
 0x12d   :  { %2266 = vmatpush.bf16.msra.mxu2 %v3698_v1  ;;  %v4197_v1 = vld [vmem:[%s6283_s3 + $0x194] sm:$0xf] }
 0x12e   :  { %2228 = vmatpush.bf16.msrb.mxu3 %v3750_v20  ;;  %v3746_v27 = vor.u32 %v4197_v1, %v3743_v2 }
 0x130   :  { %v1667_v21 = vpop.f32.mrf.mxu2 }
 0x131   :  { %2267 = vmatpush.bf16.msra.mxu2 %v3690_v7  ;;  %v1680_v8 = vpop.f32.mrf.mxu3  ;;  %v3738_v7 = vor.u32 %v4195_v16, %v3735_v4 }
 0x132   :  { %2229 = vmatpush.bf16.msrb.mxu3 %v3742_v58 }
 0x135   :  { %2268 = vmatpush.bf16.msra.mxu2 %v3682_v34 }
 0x136   :  { %2230 = vmatpush.bf16.msrb.mxu3 %v3734_v31 }
 0x139   :  { %2269 = vmatpush.bf16.msra.mxu2 %v3674_v40  ;;  %v1858_v40 = vld [vmem:[%s6284_s4] sm:$0x3] }
 0x13a   :  { %2275 = vmatpush.bf16.msra.mxu3 %v3794_v36  ;;  %v1860_v26 = vperm.slane %v1858_v40, 0  ;;  %v1861_v31 = vperm.slane %v1858_v40, 1 }
 0x13e   :  { %2276 = vmatpush.bf16.msra.mxu3 %v3786_v45  ;;  %v4215_v45 = vld [vmem:[%s6285_s5 + $0x20] sm:$0xff] }
 0x140   :  { %v1691_v39 = vpop.f32.mrf.mxu0 }
 0x141   :  { %v1692_v44 = vadd.f32 %v1691_v39, %v1679_v38  ;;  %v1704_v46 = vpop.f32.mrf.mxu1 }
 0x142   :  { %2277 = vmatpush.bf16.msra.mxu3 %v3778_v50  ;;  %v1705_v5 = vadd.f32 %v1704_v46, %v272_v3  ;;  %v4226_v46 = vld [vmem:[%s6285_s5 + $0x78] sm:$0xff]  ;;  %v4212_v50 = vld [vmem:[%s6285_s5 + $0x8] sm:$0xff] }
 0x143   :  { %v1788_v47 = vmax.f32 %v1692_v44, 0.0  ;;  %v4216_v44 = vld [vmem:[%s6285_s5 + $0x28] sm:$0xff]  ;;  %2437 = vmatpush.bf16.msrb.mxu1 %v4226_v46 }
 0x144   :  { %2426 = vmatpush.bf16.msrb.mxu0 %v4216_v44 }
 0x145   :  { %v1792_v60 = vpack.c.bf16 %v1788_v47, %v1788_v47  ;;  %v4225_v47 = vld [vmem:[%s6285_s5 + $0x70] sm:$0xff] }
 0x146   :  { %2278 = vmatpush.bf16.msra.mxu3 %v3770_v19  ;;  %v4221_v19 = vld [vmem:[%s6285_s5 + $0x50] sm:$0xff] }
 0x147   :  { %2218 = vmatmul.bf16.vlgmr.msrb.gmra.mxu2 %v1792_v60  ;;  %2438 = vmatpush.bf16.msrb.mxu1 %v4225_v47 }
 0x148   :  { %v1717_v51 = vpop.f32.mrf.mxu2  ;;  %v1693_v52 = vpop.f32.mrf.mxu0  ;;  %2427 = vmatpush.bf16.msrb.mxu0 %v4215_v45  ;;  %2520 = vmatpush.bf16.msrb.mxu2 %v4234_v61 }
 0x149   :  { %v1730_v22 = vpop.f32.mrf.mxu3  ;;  %v1706_v48 = vpop.f32.mrf.mxu1  ;;  %v1718_v9 = vadd.f32 %v1717_v51, %v1705_v5  ;;  %v4224_v51 = vld [vmem:[%s6285_s5 + $0x68] sm:$0xff]  ;;  %v4211_v52 = vld [vmem:[%s6285_s5] sm:$0xff] }
 0x14a   :  { %2279 = vmatpush.bf16.msra.mxu3 %v3762_v56  ;;  %v4219_v56 = vld [vmem:[%s6285_s5 + $0x40] sm:$0xff] }
 0x14b   :  { %v1731_v10 = vadd.f32 %v1730_v22, %v1718_v9  ;;  %2439 = vmatpush.bf16.msrb.mxu1 %v4224_v51 }
 0x14c   :  { %2428 = vmatpush.bf16.msrb.mxu0 %v4214_v49  ;;  %2521 = vmatpush.bf16.msrb.mxu2 %v4233_v57 }
 0x14e   :  { %2280 = vmatpush.bf16.msra.mxu3 %v3754_v0 }
 0x14f   :  { %2440 = vmatpush.bf16.msrb.mxu1 %v4223_v18 }
 0x150   :  { %v1719_v59 = vpop.f32.mrf.mxu2  ;;  %2429 = vmatpush.bf16.msrb.mxu0 %v4213_v24 }
 0x151   :  { %v1732_v62 = vpop.f32.mrf.mxu3 }
 0x152   :  { %2281 = vmatpush.bf16.msra.mxu3 %v3746_v27 }
 0x153   :  { %2441 = vmatpush.bf16.msrb.mxu1 %v4222_v53 }
 0x154   :  { %2430 = vmatpush.bf16.msrb.mxu0 %v4212_v50 }
 0x156   :  { %2282 = vmatpush.bf16.msra.mxu3 %v3738_v7 }
 0x157   :  { %2270 = vmatmul.bf16.vlgmr.msra.gmra.mxu2 %v1792_v60  ;;  %2442 = vmatpush.bf16.msrb.mxu1 %v4221_v19 }
 0x158   :  { %2431 = vmatpush.bf16.msrb.mxu0 %v4211_v52 }
 0x15b   :  { %2443 = vmatpush.bf16.msrb.mxu1 %v4220_v54 }
 0x15f   :  { %2444 = vmatpush.bf16.msrb.mxu1 %v4219_v56 }
 0x160   :  { %v1743_v11 = vpop.f32.mrf.mxu0 }
 0x161   :  { %v1756_v12 = vpop.f32.mrf.mxu1  ;;  %v1744_v28 = vadd.f32 %v1743_v11, %v1731_v10  ;;  %v4232_v10 = vld [vmem:[%s6287_s7 + $0x28] sm:$0xff]  ;;  %v4231_v11 = vld [vmem:[%s6287_s7 + $0x20] sm:$0xff] }
 0x162   :  { %2522 = vmatpush.bf16.msrb.mxu2 %v4232_v10 }
 0x163   :  { %v1757_v6 = vadd.f32 %v1756_v12, %v1744_v28  ;;  %v4230_v12 = vld [vmem:[%s6287_s7 + $0x18] sm:$0xff]  ;;  %v4229_v28 = vld [vmem:[%s6287_s7 + $0x10] sm:$0xff] }
 0x166   :  { %2523 = vmatpush.bf16.msrb.mxu2 %v4231_v11 }
 0x168   :  { %v1769_v13 = vpop.f32.mrf.mxu2  ;;  %v1745_v15 = vpop.f32.mrf.mxu0 }
 0x169   :  { %v1770_v14 = vadd.f32 %v1769_v13, %v1757_v6  ;;  %v1782_v34 = vpop.f32.mrf.mxu3  ;;  %v1758_v17 = vpop.f32.mrf.mxu1  ;;  %v4228_v6 = vld [vmem:[%s6287_s7 + $0x8] sm:$0xff]  ;;  %v4227_v13 = vld [vmem:[%s6287_s7] sm:$0xff] }
 0x16a   :  { %2524 = vmatpush.bf16.msrb.mxu2 %v4230_v12  ;;  %v4240_v15 = vld [vmem:[%s6289_s9 + $0x28] sm:$0xff] }
 0x16b   :  { %v1783_v21 = vadd.f32 %v1782_v34, %v1770_v14  ;;  %v4242_v14 = vld [vmem:[%s6289_s9 + $0x38] sm:$0xff]  ;;  %v4241_v34 = vld [vmem:[%s6289_s9 + $0x30] sm:$0xff] }
 0x16d   :  { %v1789_v23 = vmax.f32 %v1783_v21, 0.0  ;;  %v4239_v21 = vld [vmem:[%s6289_s9 + $0x20] sm:$0xff] }
 0x16e   :  { %2525 = vmatpush.bf16.msrb.mxu2 %v4229_v28 }
 0x16f   :  { %v1793_v43 = vpack.c.bf16 %v1789_v23, %v1789_v23  ;;  %v4238_v23 = vld [vmem:[%s6289_s9 + $0x18] sm:$0xff] }
 0x170   :  { %v1771_v8 = vpop.f32.mrf.mxu2 }
 0x171   :  { %v1784_v20 = vpop.f32.mrf.mxu3  ;;  %2231 = vmatmul.bf16.vlgmr.msrb.gmra.mxu3 %v1793_v43  ;;  %v4237_v8 = vld [vmem:[%s6289_s9 + $0x10] sm:$0xff] }
 0x172   :  { %2526 = vmatpush.bf16.msrb.mxu2 %v4228_v6  ;;  %2603 = vmatpush.bf16.msrb.mxu3 %v4242_v14  ;;  %v4244_v20 = vld [vmem:[%s6286_s6] ss:$0 sm:$0xff] }
 0x176   :  { %2527 = vmatpush.bf16.msrb.mxu2 %v4227_v13  ;;  %2604 = vmatpush.bf16.msrb.mxu3 %v4241_v34 }
 0x17a   :  { %2605 = vmatpush.bf16.msrb.mxu3 %v4240_v15 }
 0x17e   :  { %2606 = vmatpush.bf16.msrb.mxu3 %v4239_v21 }
 0x180   :  { %v2193_v25 = vpop.f32.mrf.mxu0 }
 0x181   :  { %2283 = vmatmul.bf16.vlgmr.msra.gmra.mxu3 %v1793_v43  ;;  %v2194_v29 = vadd.f32 %v2193_v25, %v1860_v26 }
 0x182   :  { %2607 = vmatpush.bf16.msrb.mxu3 %v4238_v23 }
 0x186   :  { %2608 = vmatpush.bf16.msrb.mxu3 %v4237_v8 }
 0x187   :  { %v2206_v37 = vpop.f32.mrf.mxu1 }
 0x188   :  { %v2195_v41 = vpop.f32.mrf.mxu0  ;;  %v2207_v58 = vadd.f32 %v2206_v37, %v2194_v29 }
 0x18f   :  { %v2208_v30 = vpop.f32.mrf.mxu1 }
 0x190   :  { %v4235_v30 = vld [vmem:[%s6289_s9] sm:$0xff] }
 0x1a0   :  { %v2245_v32 = vpop.f32.mrf.mxu0 }
 0x1a1   :  { %v2246_v33 = vadd.f32 %v2245_v32, %v1861_v31  ;;  %v2258_v35 = vpop.f32.mrf.mxu1  ;;  %v4245_v31 = vld [vmem:[%s6288_s8] ss:$0 sm:$0xff]  ;;  %s4277_s8 = smov [#allocation2]  }
 0x1a3   :  { %v2259_v36 = vadd.f32 %v2258_v35, %v2246_v33 }
 0x1a8   :  { %v2247_v38 = vpop.f32.mrf.mxu0 }
 0x1a9   :  { %v2260_v39 = vpop.f32.mrf.mxu1 }
 0x1aa   :  { %v4246_v39 = vld [vmem:[%s6290_s10] ss:$0 sm:$0xff] }
 0x1ca   :  { %v2219_v60 = vpop.f32.mrf.mxu2 }
 0x1cb   :  { %v2220_v59 = vadd.f32 %v2219_v60, %v2207_v58  ;;  %v4236_v58 = vld [vmem:[%s6289_s9 + $0x8] sm:$0xff]  ;;  %s2632_s9 = sshll.u32 %s4277_s8, 4  ;;  %s2633_s9 = int_to_ptr.vmem [resolvable:$true] %s2632_s9 }
 0x1cc   :  { %2609 = vmatpush.bf16.msrb.mxu3 %v4236_v58 }
 0x1d0   :  { %2610 = vmatpush.bf16.msrb.mxu3 %v4235_v30 }
 0x1d2   :  { %v2221_v22 = vpop.f32.mrf.mxu2 }
 0x1da   :  { %v2271_v48 = vpop.f32.mrf.mxu2 }
 0x1db   :  { %v2272_v27 = vadd.f32 %v2271_v48, %v2259_v36 }
 0x1e2   :  { %v2273_v55 = vpop.f32.mrf.mxu2 }
 0x1f4   :  { %v2232_v62 = vpop.f32.mrf.mxu3 }
 0x1f5   :  { %v2233_v0 = vadd.f32 %v2232_v62, %v2220_v59 }
 0x1f7   :  { %v2288_v1 = vmax.f32 %v2233_v0, 0.0 }
 0x1f9   :  { %v2290_v2 = vpack.c.bf16 %v2288_v1, %v2288_v1 }
 0x1fb   :  { %2432 = vmatmul.bf16.vlgmr.msrb.gmra.mxu0 %v2290_v2 }
 0x1fc   :  { %v2234_v3 = vpop.f32.mrf.mxu3 }
 0x204   :  { %v2284_v16 = vpop.f32.mrf.mxu3 }
 0x205   :  { %v2285_v4 = vadd.f32 %v2284_v16, %v2272_v27 }
 0x207   :  { %v2289_v5 = vmax.f32 %v2285_v4, 0.0 }
 0x209   :  { %v2291_v7 = vpack.c.bf16 %v2289_v5, %v2289_v5 }
 0x20b   :  { %2445 = vmatmul.bf16.vlgmr.msrb.gmra.mxu1 %v2291_v7 }
 0x20c   :  { %v2286_v9 = vpop.f32.mrf.mxu3 }
 0x278   :  { %v2433_v17 = vpop.f32.mrf.mxu0 }
 0x279   :  { %v2434_v25 = vadd.f32 %v4244_v20, %v2433_v17 }
 0x280   :  { %v2435_v43 = vpop.f32.mrf.mxu0 }
 0x288   :  { %v2446_v40 = vpop.f32.mrf.mxu1 }
 0x289   :  { %v2447_v41 = vadd.f32 %v2446_v40, %v2434_v25 }
 0x28b   :  { %v2450_v26 = vmax.f32 %v2447_v41, 0.0 }
 0x28d   :  { %v2451_v29 = vpack.c.bf16 %v2450_v26, %v2450_v26 }
 0x28f   :  { %2528 = vmatmul.bf16.vlgmr.msrb.gmra.mxu2 %v2451_v29 }
 0x290   :  { %v2448_v37 = vpop.f32.mrf.mxu1 }
 0x312   :  { %v2529_v32 = vpop.f32.mrf.mxu2 }
 0x313   :  { %v2530_v33 = vadd.f32 %v4245_v31, %v2529_v32 }
 0x315   :  { %v2533_v35 = vmax.f32 %v2530_v33, 0.0 }
 0x317   :  { %v2534_v36 = vpack.c.bf16 %v2533_v35, %v2533_v35 }
 0x319   :  { %2611 = vmatmul.bf16.vlgmr.msrb.gmra.mxu3 %v2534_v36 }
 0x31a   :  { %v2531_v38 = vpop.f32.mrf.mxu2 }
 0x39c   :  { %v2612_v63 = vpop.f32.mrf.mxu3 }
 0x39d   :  { %v2613_v42 = vadd.f32 %v4246_v39, %v2612_v63 }
 0x39f   :  { %2616 = vmax.xlane.f32.xlu0 %v2613_v42 }
 0x3a4   :  { %v2614_v44 = vpop.f32.mrf.mxu3 }
 0x412   :  { %v2617_v45 = vpop.xlane.xlu0 %2616 }
 0x413   :  { %v2618_v46 = vsub.f32 %v2613_v42, %v2617_v45 }
 0x415   :  { %v2619_v47 = vmul.f32 1.442695, %v2618_v46 }
 0x417   :  { %4247 = vpow2.f32 %v2619_v47 }
 0x41d   :  { %v4248_v49 = vpop.eup %4247 }
 0x41e   :  { %2621 = vadd.xlane.f32.xlu0 %v4248_v49 }
 0x491   :  { %v2622_v24 = vpop.xlane.xlu0 %2621 }
 0x492   :  { %4249 = vlog2.f32 %v2622_v24 }
 0x498   :  { %v4250_v60 = vpop.eup %4249 }
 0x499   :  { %v2624_v50 = vmul.f32 0.6931472, %v4250_v60 }
 0x49b   :  { %v2625_v51 = vsub.f32 %v2618_v46, %v2624_v50 }
 0x49d   :  { %2626 = vst [vmem:[#allocation2] sm:$0xff] %v2625_v51 }
 0x49e   :  { %2637 = dma.vmem_to_hbm [thread:$0]  %s2633_s9, 128, %s2635_s25, [#allocation3]  }
 0x49f   :  { %4275 = dma.done.wait [#allocation3], 128  }
 0x4a0   :  { %4276 = vsyncadd [#allocation3], 4294967168 }
 0x4a1   :  { %2642 = vsyncpa [#allocation3], 1 }

</bundles_post_ra>
